<compile_context>
chip_gen: v5e
topology: v5e:2x2
jax: 0.10.0
libtpu: 0.0.40
codegen_flags: <defaults>
</compile_context>

<pallas_src>
import jax
import jax.numpy as jnp
from jax.experimental import pallas as pl
from jax.experimental.pallas import tpu as pltpu

NDIM = 512     # edge feature dim
HID = 128      # type-classifier hidden dim
NTYPE = 4      # none / support / p / c
ALP = 2.2
BEL = 0.025


def _gate(w):
    """Elementwise Gate(w, alp=2.2, bel=0.025)."""
    hi = 1.0 / ALP + BEL
    return jnp.where(w <= BEL,
                     jnp.zeros_like(w),
                     jnp.where(w >= hi, jnp.ones_like(w), ALP * w - ALP * BEL))


def _round_up(x, m):
    return ((x + m - 1) // m) * m


def _cdiv(a, b):
    return -(-a // b)


def _choose_block(E, block_e):
    """Edge-tile size: large enough to amortize per-step overhead, small enough
    to cap padding waste and keep >=2 grid steps (v7x megacore) for big E."""
    block_e = max(16, _round_up(block_e, 16))
    if E <= 512:
        # single (or few) blocks; multiple of 16 rows for clean bf16 sublane packing
        return min(_round_up(E, 16), block_e)
    tile = min(block_e, _round_up(E, 256))        # never overshoot E by >255 rows
    two_step = _round_up(_cdiv(E, 2), 256)        # guarantee >=2 grid iterations
    return max(256, min(tile, two_step))


# ---------------------------------------------------------------------------
# kernel
# ---------------------------------------------------------------------------
def _pred_kernel(x_ref,
                 w1_ref, b1_ref, w2_ref, b2_ref,      # pred_mlp_edge
                 w3_ref, b3_ref, w4_ref, b4_ref,      # type_classifer (W4 padded to 128x128)
                 embed_ref, probs_ref):
    # Input arrives in f32; cast to bf16 on the VPU (slack slot in both the
    # HBM-bound and MXU-bound regimes). All matmuls accumulate in f32.
    x = x_ref[...].astype(jnp.bfloat16)                                 # [tE, 512]

    # pred_mlp_edge: Linear(512,512) + ReLU -> Linear(512,512)
    h1 = jnp.dot(x, w1_ref[...], preferred_element_type=jnp.float32) + b1_ref[...]
    h1 = jnp.maximum(h1, 0.0)
    embed = jnp.dot(h1.astype(jnp.bfloat16), w2_ref[...],
                    preferred_element_type=jnp.float32) + b2_ref[...]
    embed_ref[...] = embed.astype(embed_ref.dtype)                      # bf16 writeback

    # type_classifer: Linear(512,128) + ReLU -> Linear(128,4) (zero-padded to 128)
    t1 = jnp.dot(embed.astype(jnp.bfloat16), w3_ref[...],
                 preferred_element_type=jnp.float32) + b3_ref[...]
    t1 = jnp.maximum(t1, 0.0)
    logits = jnp.dot(t1.astype(jnp.bfloat16), w4_ref[...],
                     preferred_element_type=jnp.float32) + b4_ref[...]  # [tE, 128] f32

    # Softmax over the 4 REAL type lanes only (lanes >= 4 masked to -inf so they
    # contribute exp(-inf) = 0 and store exact zeros). exp -> EUP, recip -> EUP.
    lane = jax.lax.broadcasted_iota(jnp.int32, logits.shape, 1)
    masked = jnp.where(lane < NTYPE, logits, -jnp.inf)
    m = jnp.max(masked, axis=-1, keepdims=True)
    e = jnp.exp(masked - m)
    probs = e * pl.reciprocal(jnp.sum(e, axis=-1, keepdims=True), approx=True)
    probs_ref[...] = probs.astype(probs_ref.dtype)                      # bf16 writeback


# ---------------------------------------------------------------------------
# wrapper
# ---------------------------------------------------------------------------
def prepare_params(params):
    """One-time weight preprocessing (hoisted out of the forward path):
    bf16 matmul weights, f32 row-vector biases, Linear(128,4) zero-padded to
    (128,128) so the kernel's last matmul / softmax block is lane-dense."""
    w1, b1, w2, b2, w3, b3, w4, b4 = params
    row = lambda b: jnp.asarray(b, jnp.float32).reshape(1, -1)
    w4p = jnp.zeros((HID, HID), jnp.bfloat16).at[:, :NTYPE].set(
        jnp.asarray(w4, jnp.bfloat16))
    b4p = jnp.zeros((1, HID), jnp.float32).at[:, :NTYPE].set(row(b4))
    return (jnp.asarray(w1, jnp.bfloat16), row(b1),
            jnp.asarray(w2, jnp.bfloat16), row(b2),
            jnp.asarray(w3, jnp.bfloat16), row(b3),
            w4p, b4p)


def get_model_pred_forward(obj_codes, pred_codes, prepared_params, block_e=1024):
    """Reproduces get_model_pred.forward. obj_codes is only used for its shape
    (insnum) in the original module, so it is accepted but not consumed."""
    del obj_codes
    E = pred_codes.shape[0]
    assert pred_codes.shape[1] == NDIM

    w1b, b1f, w2b, b2f, w3b, b3f, w4p, b4p = prepared_params

    tile = _choose_block(E, block_e)
    grid = (_cdiv(E, tile),)          # partial boundary block handled by Pallas
    full = lambda shape: pl.BlockSpec(shape, lambda i: (0, 0))

    flops = 2 * E * (2 * NDIM * NDIM + NDIM * HID + HID * HID)
    bytes_accessed = (E * NDIM * 4                                       # x (f32)
                      + (2 * NDIM * NDIM + NDIM * HID + HID * HID) * 2   # weights (bf16)
                      + (2 * NDIM + 2 * HID) * 4                         # biases (f32)
                      + E * (NDIM + HID) * 2)                            # outputs (bf16)

    stream_bytes = tile * (NDIM * 4 + NDIM * 2 + HID * 2)
    vmem_limit = int(min(48 * 2**20, max(32 * 2**20, 4 * stream_bytes)))

    edge_embed, probs_pad = pl.pallas_call(
        _pred_kernel,
        out_shape=(
            jax.ShapeDtypeStruct((E, NDIM), jnp.bfloat16),   # edge_embed (bf16 writeback)
            jax.ShapeDtypeStruct((E, HID), jnp.bfloat16),    # padded softmax probs
        ),
        grid_spec=pltpu.PrefetchScalarGridSpec(
            num_scalar_prefetch=0,
            grid=grid,
            in_specs=[
                pl.BlockSpec((tile, NDIM), lambda i: (i, 0)),  # pred_codes tile (f32)
                full((NDIM, NDIM)), full((1, NDIM)),           # W1, b1
                full((NDIM, NDIM)), full((1, NDIM)),           # W2, b2
                full((NDIM, HID)),  full((1, HID)),            # W3, b3
                full((HID, HID)),   full((1, HID)),            # W4 (padded), b4 (padded)
            ],
            out_specs=[
                pl.BlockSpec((tile, NDIM), lambda i: (i, 0)),  # edge_embed
                pl.BlockSpec((tile, HID), lambda i: (i, 0)),   # padded probabilities
            ],
        ),
        compiler_params=pltpu.CompilerParams(
            dimension_semantics=("parallel",),
            vmem_limit_bytes=vmem_limit),
        cost_estimate=pl.CostEstimate(
            flops=flops, transcendentals=E * HID, bytes_accessed=bytes_accessed),
    )(pred_codes.astype(jnp.float32), w1b, b1f, w2b, b2f, w3b, b3f, w4p, b4p)

    # Tiny [E, 4] tail (types_w / Gate) in XLA — negligible vs the kernel streams.
    type_output = probs_pad[:, :NTYPE].astype(jnp.float32)
    tw = jnp.concatenate([1.0 - type_output[:, :1], type_output[:, 1:]], axis=1)
    gw = _gate(tw)

    # Match the PyTorch return structure: lists of per-type 1-D weights.
    types_w = [tw[:, i] for i in range(NTYPE)]
    multiW = [gw[:, i] for i in range(NTYPE)]
    # edge_embed is returned in bfloat16 (f32-accumulated, bf16-stored).
    return types_w, multiW, type_output, edge_embed


# ---------------------------------------------------------------------------
# deterministic parameter init (PyTorch nn.Linear-style uniform(-1/sqrt(fan_in)))
# ---------------------------------------------------------------------------
def _init_linear(key, fan_in, fan_out):
    kw, kb = jax.random.split(key)
    bound = 1.0 / float(fan_in) ** 0.5
    W = jax.random.uniform(kw, (fan_in, fan_out), jnp.float32, -bound, bound)
    b = jax.random.uniform(kb, (1, fan_out), jnp.float32, -bound, bound)
    return W, b


def _init_params(key):
    k1, k2, k3, k4 = jax.random.split(key, 4)
    w1, b1 = _init_linear(k1, NDIM, NDIM)   # pred_mlp_edge layer 1
    w2, b2 = _init_linear(k2, NDIM, NDIM)   # pred_mlp_edge layer 2
    w3, b3 = _init_linear(k3, NDIM, HID)    # type_classifer layer 1
    w4, b4 = _init_linear(k4, HID, NTYPE)   # type_classifer layer 2
    return (w1, b1, w2, b2, w3, b3, w4, b4)


def _reference(pred_codes, params):
    """Pure-JAX reference (same bf16-operand / f32-accumulate matmul recipe)."""
    w1, b1, w2, b2, w3, b3, w4, b4 = params
    bf = lambda a: a.astype(jnp.bfloat16)
    h1 = jnp.maximum(
        jnp.dot(bf(pred_codes), bf(w1), preferred_element_type=jnp.float32) + b1, 0.0)
    embed = jnp.dot(bf(h1), bf(w2), preferred_element_type=jnp.float32) + b2
    t1 = jnp.maximum(
        jnp.dot(bf(embed), bf(w3), preferred_element_type=jnp.float32) + b3, 0.0)
    logits = jnp.dot(bf(t1), bf(w4), preferred_element_type=jnp.float32) + b4
    probs = jax.nn.softmax(logits, axis=1)
    tw = jnp.concatenate([1.0 - probs[:, :1], probs[:, 1:]], axis=1)
    return probs, embed, tw, _gate(tw)


if __name__ == "__main__":
    key = jax.random.PRNGKey(0)
    kp, ko, kx = jax.random.split(key, 3)

    params = _init_params(kp)
    prepped = prepare_params(params)        # one-time, outside the forward path

    insnum = 5
    num_edges = insnum * insnum - insnum    # 20 edges (exercises partial block)
    obj_codes = jax.random.normal(ko, (insnum, NDIM), jnp.float32)
    pred_codes = jax.random.normal(kx, (num_edges, NDIM), jnp.float32)

    types_w, multiW, type_output, edge_embed = get_model_pred_forward(
        obj_codes, pred_codes, prepped, block_e=1024)

    jax.block_until_ready((types_w, multiW, type_output, edge_embed))

    # sanity check against pure-JAX reference (same bf16/f32 matmul recipe)
    probs_ref, embed_ref, tw_ref, gw_ref = _reference(pred_codes, params)
    assert type_output.shape == (num_edges, NTYPE)
    assert edge_embed.shape == (num_edges, NDIM)
    assert jnp.allclose(type_output, probs_ref, atol=2e-2), "type_output mismatch"
    assert jnp.allclose(edge_embed.astype(jnp.float32), embed_ref,
                        atol=2e-2, rtol=2e-2), "edge_embed mismatch"
    assert jnp.allclose(jnp.stack(types_w, axis=1), tw_ref, atol=2e-2), "types_w mismatch"
    assert jnp.allclose(jnp.stack(multiW, axis=1), gw_ref, atol=5e-2), "multiW mismatch"

    print("KERNEL_OK")
</pallas_src>

<mosaic_0001>
module attributes {stable_mosaic.version = 11 : i64} {
  func.func @_pred_kernel(%arg0: i32, %arg1: memref<32x512xf32, #tpu.memory_space<vmem>>, %arg2: memref<512x512xbf16, #tpu.memory_space<vmem>>, %arg3: memref<1x512xf32, #tpu.memory_space<vmem>>, %arg4: memref<512x512xbf16, #tpu.memory_space<vmem>>, %arg5: memref<1x512xf32, #tpu.memory_space<vmem>>, %arg6: memref<512x128xbf16, #tpu.memory_space<vmem>>, %arg7: memref<1x128xf32, #tpu.memory_space<vmem>>, %arg8: memref<128x128xbf16, #tpu.memory_space<vmem>>, %arg9: memref<1x128xf32, #tpu.memory_space<vmem>>, %arg10: memref<32x512xbf16, #tpu.memory_space<vmem>>, %arg11: memref<32x128xbf16, #tpu.memory_space<vmem>>) attributes {dimension_semantics = [#tpu.dimension_semantics<parallel>], iteration_bounds = array<i64: 1>, scalar_prefetch = 0 : i64, scratch_operands = 0 : i64, tpu.core_type = #tpu.core_type<tc>, window_params = [{transform_indices = @transform_0, window_bounds = array<i64: 32, 512>}, {pipeline_mode = #tpu.pipeline_mode<synchronous>, transform_indices = @transform_1, window_bounds = array<i64: 512, 512>}, {pipeline_mode = #tpu.pipeline_mode<synchronous>, transform_indices = @transform_2, window_bounds = array<i64: 1, 512>}, {pipeline_mode = #tpu.pipeline_mode<synchronous>, transform_indices = @transform_3, window_bounds = array<i64: 512, 512>}, {pipeline_mode = #tpu.pipeline_mode<synchronous>, transform_indices = @transform_4, window_bounds = array<i64: 1, 512>}, {pipeline_mode = #tpu.pipeline_mode<synchronous>, transform_indices = @transform_5, window_bounds = array<i64: 512, 128>}, {pipeline_mode = #tpu.pipeline_mode<synchronous>, transform_indices = @transform_6, window_bounds = array<i64: 1, 128>}, {pipeline_mode = #tpu.pipeline_mode<synchronous>, transform_indices = @transform_7, window_bounds = array<i64: 128, 128>}, {pipeline_mode = #tpu.pipeline_mode<synchronous>, transform_indices = @transform_8, window_bounds = array<i64: 1, 128>}, {transform_indices = @transform_9, window_bounds = array<i64: 32, 512>}, {transform_indices = @transform_10, window_bounds = array<i64: 32, 128>}]} {
    %c0 = arith.constant 0 : index
    %c0_0 = arith.constant 0 : index
    %0 = vector.load %arg1[%c0, %c0_0] : memref<32x512xf32, #tpu.memory_space<vmem>>, vector<32x512xf32>
    %1 = arith.truncf %0 : vector<32x512xf32> to vector<32x512xbf16>
    %c0_1 = arith.constant 0 : index
    %c0_2 = arith.constant 0 : index
    %2 = vector.load %arg2[%c0_1, %c0_2] : memref<512x512xbf16, #tpu.memory_space<vmem>>, vector<512x512xbf16>
    %cst = arith.constant dense<0.000000e+00> : vector<32x512xf32>
    %3 = tpu.matmul %1, %2, %cst {dimension_numbers = #tpu.dot_dimension_numbers<[1], [0], [0], [1], [0, 0, 1, 1], [], []>} : vector<32x512xbf16>, vector<512x512xbf16>, vector<32x512xf32> -> vector<32x512xf32>
    %c0_3 = arith.constant 0 : index
    %c0_4 = arith.constant 0 : index
    %4 = vector.load %arg3[%c0_3, %c0_4] : memref<1x512xf32, #tpu.memory_space<vmem>>, vector<1x512xf32>
    %5 = vector.broadcast %4 : vector<1x512xf32> to vector<32x512xf32>
    %6 = arith.addf %3, %5 : vector<32x512xf32>
    %cst_5 = arith.constant 0.000000e+00 : f32
    %7 = vector.broadcast %cst_5 : f32 to vector<32x512xf32>
    %8 = arith.maximumf %6, %7 : vector<32x512xf32>
    %9 = arith.truncf %8 : vector<32x512xf32> to vector<32x512xbf16>
    %c0_6 = arith.constant 0 : index
    %c0_7 = arith.constant 0 : index
    %10 = vector.load %arg4[%c0_6, %c0_7] : memref<512x512xbf16, #tpu.memory_space<vmem>>, vector<512x512xbf16>
    %cst_8 = arith.constant dense<0.000000e+00> : vector<32x512xf32>
    %11 = tpu.matmul %9, %10, %cst_8 {dimension_numbers = #tpu.dot_dimension_numbers<[1], [0], [0], [1], [0, 0, 1, 1], [], []>} : vector<32x512xbf16>, vector<512x512xbf16>, vector<32x512xf32> -> vector<32x512xf32>
    %c0_9 = arith.constant 0 : index
    %c0_10 = arith.constant 0 : index
    %12 = vector.load %arg5[%c0_9, %c0_10] : memref<1x512xf32, #tpu.memory_space<vmem>>, vector<1x512xf32>
    %13 = vector.broadcast %12 : vector<1x512xf32> to vector<32x512xf32>
    %14 = arith.addf %11, %13 : vector<32x512xf32>
    %15 = arith.truncf %14 : vector<32x512xf32> to vector<32x512xbf16>
    %c0_11 = arith.constant 0 : index
    %c0_12 = arith.constant 0 : index
    %16 = vector.load %arg10[%c0_11, %c0_12] : memref<32x512xbf16, #tpu.memory_space<vmem>>, vector<32x512xbf16>
    tpu.vector_store %arg10[%c0_11, %c0_12], %15 {strides = array<i32>} : memref<32x512xbf16, #tpu.memory_space<vmem>>, vector<32x512xbf16>,
    %17 = arith.truncf %14 : vector<32x512xf32> to vector<32x512xbf16>
    %c0_13 = arith.constant 0 : index
    %c0_14 = arith.constant 0 : index
    %18 = vector.load %arg6[%c0_13, %c0_14] : memref<512x128xbf16, #tpu.memory_space<vmem>>, vector<512x128xbf16>
    %cst_15 = arith.constant dense<0.000000e+00> : vector<32x128xf32>
    %19 = tpu.matmul %17, %18, %cst_15 {dimension_numbers = #tpu.dot_dimension_numbers<[1], [0], [0], [1], [0, 0, 1, 1], [], []>} : vector<32x512xbf16>, vector<512x128xbf16>, vector<32x128xf32> -> vector<32x128xf32>
    %c0_16 = arith.constant 0 : index
    %c0_17 = arith.constant 0 : index
    %20 = vector.load %arg7[%c0_16, %c0_17] : memref<1x128xf32, #tpu.memory_space<vmem>>, vector<1x128xf32>
    %21 = vector.broadcast %20 : vector<1x128xf32> to vector<32x128xf32>
    %22 = arith.addf %19, %21 : vector<32x128xf32>
    %cst_18 = arith.constant 0.000000e+00 : f32
    %23 = vector.broadcast %cst_18 : f32 to vector<32x128xf32>
    %24 = arith.maximumf %22, %23 : vector<32x128xf32>
    %25 = arith.truncf %24 : vector<32x128xf32> to vector<32x128xbf16>
    %c0_19 = arith.constant 0 : index
    %c0_20 = arith.constant 0 : index
    %26 = vector.load %arg8[%c0_19, %c0_20] : memref<128x128xbf16, #tpu.memory_space<vmem>>, vector<128x128xbf16>
    %cst_21 = arith.constant dense<0.000000e+00> : vector<32x128xf32>
    %27 = tpu.matmul %25, %26, %cst_21 {dimension_numbers = #tpu.dot_dimension_numbers<[1], [0], [0], [1], [0, 0, 1, 1], [], []>} : vector<32x128xbf16>, vector<128x128xbf16>, vector<32x128xf32> -> vector<32x128xf32>
    %c0_22 = arith.constant 0 : index
    %c0_23 = arith.constant 0 : index
    %28 = vector.load %arg9[%c0_22, %c0_23] : memref<1x128xf32, #tpu.memory_space<vmem>>, vector<1x128xf32>
    %29 = vector.broadcast %28 : vector<1x128xf32> to vector<32x128xf32>
    %30 = arith.addf %27, %29 : vector<32x128xf32>
    %31 = tpu.iota {dimensions = array<i32: 1>} : vector<32x128xi32>
    %c4_i32 = arith.constant 4 : i32
    %32 = vector.broadcast %c4_i32 : i32 to vector<32x128xi32>
    %33 = arith.cmpi slt, %31, %32 : vector<32x128xi32>
    %cst_24 = arith.constant 0xFF800000 : f32
    %34 = vector.broadcast %cst_24 : f32 to vector<32x128xf32>
    %35 = arith.select %33, %30, %34 : vector<32x128xi1>, vector<32x128xf32>
    %cst_25 = arith.constant dense<0xFF800000> : vector<32xf32>
    %36 = vector.multi_reduction <maximumf>, %35, %cst_25 [1] : vector<32x128xf32> to vector<32xf32>
    %37 = vector.shape_cast %36 : vector<32xf32> to vector<32x1xf32>
    %38 = vector.broadcast %37 : vector<32x1xf32> to vector<32x128xf32>
    %39 = arith.subf %35, %38 : vector<32x128xf32>
    %40 = math.exp %39 : vector<32x128xf32>
    %cst_26 = arith.constant dense<0.000000e+00> : vector<32xf32>
    %41 = vector.multi_reduction <add>, %40, %cst_26 [1] : vector<32x128xf32> to vector<32xf32>
    %42 = vector.shape_cast %41 : vector<32xf32> to vector<32x1xf32>
    %43 = tpu.reciprocal %42 {approx = true} : vector<32x1xf32> -> vector<32x1xf32>
    %44 = vector.broadcast %43 : vector<32x1xf32> to vector<32x128xf32>
    %45 = arith.mulf %40, %44 : vector<32x128xf32>
    %46 = arith.truncf %45 : vector<32x128xf32> to vector<32x128xbf16>
    %c0_27 = arith.constant 0 : index
    %c0_28 = arith.constant 0 : index
    %47 = vector.load %arg11[%c0_27, %c0_28] : memref<32x128xbf16, #tpu.memory_space<vmem>>, vector<32x128xbf16>
    tpu.vector_store %arg11[%c0_27, %c0_28], %46 {strides = array<i32>} : memref<32x128xbf16, #tpu.memory_space<vmem>>, vector<32x128xbf16>,
    return
  }
  func.func @transform_0(%arg0: i32) -> (i32, i32) {
    %c0_i32 = arith.constant 0 : i32
    %c0_i32_0 = arith.constant 0 : i32
    return %arg0, %c0_i32 : i32, i32
  }
  func.func @transform_1(%arg0: i32) -> (i32, i32) {
    %c0_i32 = arith.constant 0 : i32
    %c0_i32_0 = arith.constant 0 : i32
    %c0_i32_1 = arith.constant 0 : i32
    return %c0_i32, %c0_i32_0 : i32, i32
  }
  func.func @transform_2(%arg0: i32) -> (i32, i32) {
    %c0_i32 = arith.constant 0 : i32
    %c0_i32_0 = arith.constant 0 : i32
    %c0_i32_1 = arith.constant 0 : i32
    return %c0_i32, %c0_i32_0 : i32, i32
  }
  func.func @transform_3(%arg0: i32) -> (i32, i32) {
    %c0_i32 = arith.constant 0 : i32
    %c0_i32_0 = arith.constant 0 : i32
    %c0_i32_1 = arith.constant 0 : i32
    return %c0_i32, %c0_i32_0 : i32, i32
  }
  func.func @transform_4(%arg0: i32) -> (i32, i32) {
    %c0_i32 = arith.constant 0 : i32
    %c0_i32_0 = arith.constant 0 : i32
    %c0_i32_1 = arith.constant 0 : i32
    return %c0_i32, %c0_i32_0 : i32, i32
  }
  func.func @transform_5(%arg0: i32) -> (i32, i32) {
    %c0_i32 = arith.constant 0 : i32
    %c0_i32_0 = arith.constant 0 : i32
    %c0_i32_1 = arith.constant 0 : i32
    return %c0_i32, %c0_i32_0 : i32, i32
  }
  func.func @transform_6(%arg0: i32) -> (i32, i32) {
    %c0_i32 = arith.constant 0 : i32
    %c0_i32_0 = arith.constant 0 : i32
    %c0_i32_1 = arith.constant 0 : i32
    return %c0_i32, %c0_i32_0 : i32, i32
  }
  func.func @transform_7(%arg0: i32) -> (i32, i32) {
    %c0_i32 = arith.constant 0 : i32
    %c0_i32_0 = arith.constant 0 : i32
    %c0_i32_1 = arith.constant 0 : i32
    return %c0_i32, %c0_i32_0 : i32, i32
  }
  func.func @transform_8(%arg0: i32) -> (i32, i32) {
    %c0_i32 = arith.constant 0 : i32
    %c0_i32_0 = arith.constant 0 : i32
    %c0_i32_1 = arith.constant 0 : i32
    return %c0_i32, %c0_i32_0 : i32, i32
  }
  func.func @transform_9(%arg0: i32) -> (i32, i32) {
    %c0_i32 = arith.constant 0 : i32
    %c0_i32_0 = arith.constant 0 : i32
    return %arg0, %c0_i32 : i32, i32
  }
  func.func @transform_10(%arg0: i32) -> (i32, i32) {
    %c0_i32 = arith.constant 0 : i32
    %c0_i32_0 = arith.constant 0 : i32
    return %arg0, %c0_i32 : i32, i32
  }
}

</mosaic_0001>

<bundles_post_ra>
// kernel: tpu_custom_call.1
= control target key start
LH: loop header
LB: loop body
LE: loop exit
PB: predicated region body
PF: predicated region fallthrough
CT: control target
= control target key end

     0   :  { %16 = vsyncpa [#allocation3], 0  ;;  %s5005_s0 = inlined_call_operand.hbm [shape: f32[20,512], index: 0, kind: input, shape index: {}]   ;;  %s5006_s1 = inlined_call_operand.hbm [shape: bf16[512,512], index: 1, kind: input, shape index: {}]   ;;  %s5007_s2 = inlined_call_operand.hbm [shape: f32[1,512], index: 2, kind: input, shape index: {}]   ;;  %s5008_s3 = inlined_call_operand.hbm [shape: bf16[512,512], index: 3, kind: input, shape index: {}]   ;;  %s5009_s4 = inlined_call_operand.hbm [shape: f32[1,512], index: 4, kind: input, shape index: {}]   ;;  %s5010_s5 = inlined_call_operand.hbm [shape: bf16[512,128], index: 5, kind: input, shape index: {}]   ;;  %s5011_s6 = inlined_call_operand.vmem [shape: f32[1,128], index: 6, kind: input, shape index: {}]   ;;  %s5012_s7 = inlined_call_operand.hbm [shape: bf16[128,128], index: 7, kind: input, shape index: {}]   ;;  %s5013_s8 = inlined_call_operand.vmem [shape: f32[1,128], index: 8, kind: input, shape index: {}]   ;;  %s5014_s9 = inlined_call_operand.hbm [shape: bf16[20,512], index: 9, kind: output, shape index: {0}]   ;;  %s5015_s10 = inlined_call_operand.hbm [shape: bf16[20,128], index: 10, kind: output, shape index: {1}]  }
   0x1   :  { %17 = vsyncpa [#allocation6], 0 }
   0x2   :  { %18 = vsyncpa [#allocation9], 0 }
   0x3   :  { %19 = vsyncpa [#allocation12], 0 }
   0x4   :  { %20 = vsyncpa [#allocation4], 0 }
   0x5   :  { %21 = vsyncpa [#allocation16], 0  ;;  %s39_s15 = sshll.u32 %s5006_s1, 4  ;;  %s40_s15 = int_to_ptr.hbm [resolvable:$true] %s39_s15 }
   0x6   :  { %25 = vsyncadd [#allocation3], 512  ;;  %s4689_s16 = smov [#allocation5]   ;;  %s63_s20 = sshll.u32 %s5008_s3, 4  ;;  %s64_s20 = int_to_ptr.hbm [resolvable:$true] %s63_s20 }
   0x7   :  { %s41_s17 = sshll.u32 %s4689_s16, 4  ;;  %s4690_s21 = smov 256   ;;  %s42_s17 = int_to_ptr.vmem [resolvable:$true] %s41_s17 }
   0x8   :  { %s4691_s22 = smov 16   ;;  %s4692_s23 = smov [#allocation8]  }
   0x9   :  { %47 = dma.hbm_to_vmem [thread:$0]  %s40_s15, 16384, %s42_s17, [#allocation6], %s4690_s21, %s4690_s21, %s4691_s22  }
   0xa   :  { %s65_s24 = sshll.u32 %s4692_s23, 4  ;;  %s87_s26 = sshll.u32 %s5010_s5, 4  ;;  %s66_s24 = int_to_ptr.vmem [resolvable:$true] %s65_s24  ;;  %s88_s26 = int_to_ptr.hbm [resolvable:$true] %s87_s26 }
   0xb   :  { %71 = dma.hbm_to_vmem [thread:$0]  %s64_s20, 16384, %s66_s24, [#allocation9], %s4690_s21, %s4690_s21, %s4691_s22  }
   0xc   :  { %s4693_s3 = smov [#allocation11]   ;;  %s26_s30 = sshll.u32 %s5005_s0, 4  ;;  %s27_s30 = int_to_ptr.hbm [resolvable:$true] %s26_s30 }
   0xd   :  { %s89_s27 = sshll.u32 %s4693_s3, 4  ;;  %s4694_s11 = smov 64   ;;  %s90_s27 = int_to_ptr.vmem [resolvable:$true] %s89_s27 }
   0xe   :  { %s4695_s12 = smov 4   ;;  %s4696_s5 = smov [#allocation2]  }
   0xf   :  { %95 = dma.hbm_to_vmem [thread:$0]  %s88_s26, 4096, %s90_s27, [#allocation12], %s4694_s11, %s4694_s11, %s4695_s12  }
  0x10   :  { %s28_s13 = sshll.u32 %s4696_s5, 4  ;;  %s4697_s14 = smov 512   ;;  %s29_s13 = int_to_ptr.vmem [resolvable:$true] %s28_s13 }
  0x11   :  { %s4698_s15 = smov 32   ;;  %s53_s18 = sshll.u32 %s5007_s2, 4  ;;  %s54_s18 = int_to_ptr.hbm [resolvable:$true] %s53_s18 }
  0x12   :  { %34 = dma.hbm_to_vmem [thread:$0]  %s27_s30, 1536, %s29_s13, [#allocation3], %s4697_s14, %s4697_s14, %s4698_s15  }
  0x13   :  { %s4699_s19 = smov [#allocation7]   ;;  %s77_s24 = sshll.u32 %s5009_s4, 4  ;;  %s78_s24 = int_to_ptr.hbm [resolvable:$true] %s77_s24 }
  0x14   :  { %s55_s0 = sshll.u32 %s4699_s19, 4  ;;  %s4700_s25 = smov [#allocation10]   ;;  %s56_s0 = int_to_ptr.vmem [resolvable:$true] %s55_s0 }
  0x15   :  { %58 = dma.hbm_to_vmem [thread:$0]  %s54_s18, 64, %s56_s0, [#allocation6]  }
  0x16   :  { %s79_s1 = sshll.u32 %s4700_s25, 4  ;;  %s102_s27 = sshll.u32 %s5012_s7, 4  ;;  %s80_s1 = int_to_ptr.vmem [resolvable:$true] %s79_s1  ;;  %s103_s27 = int_to_ptr.hbm [resolvable:$true] %s102_s27 }
  0x17   :  { %82 = dma.hbm_to_vmem [thread:$0]  %s78_s24, 64, %s80_s1, [#allocation9]  }
  0x18   :  { %s4701_s2 = smov [#allocation13]  }
  0x19   :  { %s104_s28 = sshll.u32 %s4701_s2, 4  ;;  %s105_s28 = int_to_ptr.vmem [resolvable:$true] %s104_s28 }
  0x1a   :  { %110 = dma.hbm_to_vmem [thread:$0]  %s103_s27, 1024, %s105_s28, [#allocation12], %s4694_s11, %s4694_s11, %s4695_s12  }
  0x1b   :  { %4677 = dma.done.wait [#allocation3], 2048  }
  0x1c   :  { %4678 = vsyncadd [#allocation3], 4294965248 }
  0x1d   :  { %4679 = dma.done.wait [#allocation6], 16448  }
  0x1e   :  { %4680 = vsyncadd [#allocation6], 4294950848 }
  0x1f   :  { %4681 = dma.done.wait [#allocation9], 16448  }
  0x20   :  { %4682 = vsyncadd [#allocation9], 4294950848 }
  0x21   :  { %4683 = dma.done.wait [#allocation12], 5120  }
  0x22   :  { %4684 = vsyncadd [#allocation12], 4294962176  ;;  %v3043_v0 = vld [vmem:[#allocation5 + $0xe0] sm:$0xf]  ;;  %v4143_v1 = vld [vmem:[#allocation5 + $0xec] sm:$0xf0] }
  0x23   :  { %v3171_v2 = vld [vmem:[#allocation5 + $0x1e0] sm:$0xf]  ;;  %v3044_v3 = vor.u32 %v4143_v1, %v3043_v0  ;;  %v4175_v4 = vld [vmem:[#allocation5 + $0x1ec] sm:$0xf0] }
  0x24   :  { %v3299_v5 = vld [vmem:[#allocation5 + $0x2e0] sm:$0xf]  ;;  %v4207_v6 = vld [vmem:[#allocation5 + $0x2ec] sm:$0xf0]  ;;  %v3172_v7 = vor.u32 %v4175_v4, %v3171_v2 }
  0x25   :  { %v3300_v8 = vor.u32 %v4207_v6, %v3299_v5  ;;  %v3427_v9 = vld [vmem:[#allocation5 + $0x3e0] sm:$0xf]  ;;  %v4239_v10 = vld [vmem:[#allocation5 + $0x3ec] sm:$0xf0]  ;;  %943 = vmatpush.bf16.msra.mxu0 %v3044_v3 }
  0x26   :  { %v3027_v11 = vld [vmem:[#allocation5 + $0xc0] sm:$0xf]  ;;  %v3428_v12 = vor.u32 %v4239_v10, %v3427_v9  ;;  %v4139_v13 = vld [vmem:[#allocation5 + $0xcc] sm:$0xf0]  ;;  %962 = vmatpush.bf16.msra.mxu1 %v3172_v7 }
  0x27   :  { %v3155_v14 = vld [vmem:[#allocation5 + $0x1c0] sm:$0xf]  ;;  %v4171_v15 = vld [vmem:[#allocation5 + $0x1cc] sm:$0xf0]  ;;  %981 = vmatpush.bf16.msra.mxu2 %v3300_v8  ;;  %v3028_v16 = vor.u32 %v4139_v13, %v3027_v11 }
  0x28   :  { %v3156_v17 = vor.u32 %v4171_v15, %v3155_v14  ;;  %v3283_v18 = vld [vmem:[#allocation5 + $0x2c0] sm:$0xf]  ;;  %v4203_v19 = vld [vmem:[#allocation5 + $0x2cc] sm:$0xf0]  ;;  %1000 = vmatpush.bf16.msra.mxu3 %v3428_v12 }
  0x29   :  { %v3411_v20 = vld [vmem:[#allocation5 + $0x3c0] sm:$0xf]  ;;  %v3284_v21 = vor.u32 %v4203_v19, %v3283_v18  ;;  %v4235_v22 = vld [vmem:[#allocation5 + $0x3cc] sm:$0xf0]  ;;  %944 = vmatpush.bf16.msra.mxu0 %v3028_v16 }
  0x2a   :  { %v3011_v23 = vld [vmem:[#allocation5 + $0xa0] sm:$0xf]  ;;  %v4135_v24 = vld [vmem:[#allocation5 + $0xac] sm:$0xf0]  ;;  %v3412_v25 = vor.u32 %v4235_v22, %v3411_v20  ;;  %963 = vmatpush.bf16.msra.mxu1 %v3156_v17 }
  0x2b   :  { %v3139_v26 = vld [vmem:[#allocation5 + $0x1a0] sm:$0xf]  ;;  %v4167_v27 = vld [vmem:[#allocation5 + $0x1ac] sm:$0xf0]  ;;  %v3012_v29 = vor.u32 %v4135_v24, %v3011_v23  ;;  %982 = vmatpush.bf16.msra.mxu2 %v3284_v21 }
  0x2c   :  { %v3267_v28 = vld [vmem:[#allocation5 + $0x2a0] sm:$0xf]  ;;  %v4199_v30 = vld [vmem:[#allocation5 + $0x2ac] sm:$0xf0]  ;;  %v3140_v33 = vor.u32 %v4167_v27, %v3139_v26  ;;  %1001 = vmatpush.bf16.msra.mxu3 %v3412_v25 }
  0x2d   :  { %v3395_v31 = vld [vmem:[#allocation5 + $0x3a0] sm:$0xf]  ;;  %v4231_v32 = vld [vmem:[#allocation5 + $0x3ac] sm:$0xf0]  ;;  %v3268_v34 = vor.u32 %v4199_v30, %v3267_v28  ;;  %945 = vmatpush.bf16.msra.mxu0 %v3012_v29  ;;  %v142_v30 = vld [vmem:[#allocation2 + $0x8] sm:$0xff] }
  0x2e   :  { %v2995_v35 = vld [vmem:[#allocation5 + $0x80] sm:$0xf]  ;;  %v4131_v36 = vld [vmem:[#allocation5 + $0x8c] sm:$0xf0]  ;;  %v3396_v38 = vor.u32 %v4231_v32, %v3395_v31  ;;  %964 = vmatpush.bf16.msra.mxu1 %v3140_v33  ;;  %v146_v31 = vld [vmem:[#allocation2 + $0x28] sm:$0xff] }
  0x2f   :  { %v3123_v37 = vld [vmem:[#allocation5 + $0x180] sm:$0xf]  ;;  %v4163_v39 = vld [vmem:[#allocation5 + $0x18c] sm:$0xf0]  ;;  %v2996_v44 = vor.u32 %v4131_v36, %v2995_v35  ;;  %983 = vmatpush.bf16.msra.mxu2 %v3268_v34  ;;  %v4205_v32 = vld [vmem:[#allocation5 + $0x2e4] sm:$0xf] }
  0x30   :  { %v3251_v40 = vld [vmem:[#allocation5 + $0x280] sm:$0xf]  ;;  %v4195_v41 = vld [vmem:[#allocation5 + $0x28c] sm:$0xf0]  ;;  %v3124_v45 = vor.u32 %v4163_v39, %v3123_v37  ;;  %1002 = vmatpush.bf16.msra.mxu3 %v3396_v38  ;;  %v3301_v33 = vld [vmem:[#allocation5 + $0x2f0] sm:$0xf0] }
  0x31   :  { %v3379_v42 = vld [vmem:[#allocation5 + $0x380] sm:$0xf]  ;;  %v4227_v43 = vld [vmem:[#allocation5 + $0x38c] sm:$0xf0]  ;;  %v3252_v46 = vor.u32 %v4195_v41, %v3251_v40  ;;  %946 = vmatpush.bf16.msra.mxu0 %v2996_v44  ;;  %v4173_v36 = vld [vmem:[#allocation5 + $0x1e4] sm:$0xf]  ;;  %v3304_v44 = vor.u32 %v4205_v32, %v3301_v33 }
  0x32   :  { %v2979_v47 = vld [vmem:[#allocation5 + $0x60] sm:$0xf]  ;;  %v4127_v48 = vld [vmem:[#allocation5 + $0x6c] sm:$0xf0]  ;;  %v3380_v50 = vor.u32 %v4227_v43, %v3379_v42  ;;  %965 = vmatpush.bf16.msra.mxu1 %v3124_v45  ;;  %v3173_v37 = vld [vmem:[#allocation5 + $0x1f0] sm:$0xf0] }
  0x33   :  { %v3107_v49 = vld [vmem:[#allocation5 + $0x160] sm:$0xf]  ;;  %v4159_v51 = vld [vmem:[#allocation5 + $0x16c] sm:$0xf0]  ;;  %v2980_v56 = vor.u32 %v4127_v48, %v2979_v47  ;;  %984 = vmatpush.bf16.msra.mxu2 %v3252_v46  ;;  %v144_v41 = vld [vmem:[#allocation2 + $0x18] sm:$0xff] }
  0x34   :  { %v3235_v52 = vld [vmem:[#allocation5 + $0x260] sm:$0xf]  ;;  %v4191_v53 = vld [vmem:[#allocation5 + $0x26c] sm:$0xf0]  ;;  %v3108_v57 = vor.u32 %v4159_v51, %v3107_v49  ;;  %1003 = vmatpush.bf16.msra.mxu3 %v3380_v50  ;;  %v148_v42 = vld [vmem:[#allocation2 + $0x38] sm:$0xff]  ;;  %v3176_v49 = vor.u32 %v4173_v36, %v3173_v37 }
  0x35   :  { %v3363_v54 = vld [vmem:[#allocation5 + $0x360] sm:$0xf]  ;;  %v4223_v55 = vld [vmem:[#allocation5 + $0x36c] sm:$0xf0]  ;;  %v3236_v58 = vor.u32 %v4191_v53, %v3235_v52  ;;  %947 = vmatpush.bf16.msra.mxu0 %v2980_v56  ;;  %v4141_v45 = vld [vmem:[#allocation5 + $0xe4] sm:$0xf]  ;;  %v4794_v53 = vpack.c.bf16 %v146_v31, %v142_v30 }
  0x36   :  { %v2963_v59 = vld [vmem:[#allocation5 + $0x40] sm:$0xf]  ;;  %v4123_v60 = vld [vmem:[#allocation5 + $0x4c] sm:$0xf0]  ;;  %v3364_v62 = vor.u32 %v4223_v55, %v3363_v54  ;;  %966 = vmatpush.bf16.msra.mxu1 %v3108_v57  ;;  %v3045_v46 = vld [vmem:[#allocation5 + $0xf0] sm:$0xf0]  ;;  %v4798_v57 = vpack.c.bf16 %v148_v42, %v144_v41 }
  0x37   :  { %v3091_v61 = vld [vmem:[#allocation5 + $0x140] sm:$0xf]  ;;  %v4155_v63 = vld [vmem:[#allocation5 + $0x14c] sm:$0xf0]  ;;  %v2964_v4 = vor.u32 %v4123_v60, %v2963_v59  ;;  %985 = vmatpush.bf16.msra.mxu2 %v3236_v58  ;;  %v4237_v47 = vld [vmem:[#allocation5 + $0x3e4] sm:$0xf]  ;;  %v3048_v58 = vor.u32 %v4141_v45, %v3045_v46 }
  0x38   :  { %v3219_v0 = vld [vmem:[#allocation5 + $0x240] sm:$0xf]  ;;  %v4187_v1 = vld [vmem:[#allocation5 + $0x24c] sm:$0xf0]  ;;  %v3092_v5 = vor.u32 %v4155_v63, %v3091_v61  ;;  %1004 = vmatpush.bf16.msra.mxu3 %v3364_v62  ;;  %v3429_v50 = vld [vmem:[#allocation5 + $0x3f0] sm:$0xf0] }
  0x39   :  { %v3347_v2 = vld [vmem:[#allocation5 + $0x340] sm:$0xf]  ;;  %v4219_v3 = vld [vmem:[#allocation5 + $0x34c] sm:$0xf0]  ;;  %v3220_v6 = vor.u32 %v4187_v1, %v3219_v0  ;;  %948 = vmatpush.bf16.msra.mxu0 %v2964_v4  ;;  %v4201_v51 = vld [vmem:[#allocation5 + $0x2c4] sm:$0xf]  ;;  %v3432_v59 = vor.u32 %v4237_v47, %v3429_v50 }
  0x3a   :  { %v2947_v7 = vld [vmem:[#allocation5 + $0x20] sm:$0xf]  ;;  %v4119_v8 = vld [vmem:[#allocation5 + $0x2c] sm:$0xf0]  ;;  %v3348_v10 = vor.u32 %v4219_v3, %v3347_v2  ;;  %967 = vmatpush.bf16.msra.mxu1 %v3092_v5  ;;  %v3285_v52 = vld [vmem:[#allocation5 + $0x2d0] sm:$0xf0] }
  0x3b   :  { %v3075_v9 = vld [vmem:[#allocation5 + $0x120] sm:$0xf]  ;;  %v4151_v11 = vld [vmem:[#allocation5 + $0x12c] sm:$0xf0]  ;;  %v2948_v17 = vor.u32 %v4119_v8, %v2947_v7  ;;  %986 = vmatpush.bf16.msra.mxu2 %v3220_v6  ;;  %v4169_v55 = vld [vmem:[#allocation5 + $0x1c4] sm:$0xf]  ;;  %v3288_v60 = vor.u32 %v4201_v51, %v3285_v52 }
  0x3c   :  { %v3203_v12 = vld [vmem:[#allocation5 + $0x220] sm:$0xf]  ;;  %v4183_v13 = vld [vmem:[#allocation5 + $0x22c] sm:$0xf0]  ;;  %v3076_v21 = vor.u32 %v4151_v11, %v3075_v9  ;;  %1005 = vmatpush.bf16.msra.mxu3 %v3348_v10  ;;  %v3157_v56 = vld [vmem:[#allocation5 + $0x1d0] sm:$0xf0] }
  0x3d   :  { %v3331_v14 = vld [vmem:[#allocation5 + $0x320] sm:$0xf]  ;;  %v4215_v15 = vld [vmem:[#allocation5 + $0x32c] sm:$0xf0]  ;;  %v3204_v22 = vor.u32 %v4183_v13, %v3203_v12  ;;  %949 = vmatpush.bf16.msra.mxu0 %v2948_v17  ;;  %v4137_v61 = vld [vmem:[#allocation5 + $0xc4] sm:$0xf]  ;;  %v3160_v0 = vor.u32 %v4169_v55, %v3157_v56 }
  0x3e   :  { %v2931_v16 = vld [vmem:[#allocation5] sm:$0xf]  ;;  %v4115_v18 = vld [vmem:[#allocation5 + $0xc] sm:$0xf0]  ;;  %v3332_v26 = vor.u32 %v4215_v15, %v3331_v14  ;;  %968 = vmatpush.bf16.msra.mxu1 %v3076_v21  ;;  %v3029_v62 = vld [vmem:[#allocation5 + $0xd0] sm:$0xf0] }
  0x3f   :  { %v3059_v19 = vld [vmem:[#allocation5 + $0x100] sm:$0xf]  ;;  %v4147_v20 = vld [vmem:[#allocation5 + $0x10c] sm:$0xf0]  ;;  %v2932_v34 = vor.u32 %v4115_v18, %v2931_v16  ;;  %987 = vmatpush.bf16.msra.mxu2 %v3204_v22  ;;  %v4233_v63 = vld [vmem:[#allocation5 + $0x3c4] sm:$0xf]  ;;  %v3032_v6 = vor.u32 %v4137_v61, %v3029_v62 }
  0x40   :  { %v3187_v23 = vld [vmem:[#allocation5 + $0x200] sm:$0xf]  ;;  %v4179_v24 = vld [vmem:[#allocation5 + $0x20c] sm:$0xf0]  ;;  %v3060_v38 = vor.u32 %v4147_v20, %v3059_v19  ;;  %1006 = vmatpush.bf16.msra.mxu3 %v3332_v26  ;;  %v3413_v1 = vld [vmem:[#allocation5 + $0x3d0] sm:$0xf0] }
  0x41   :  { %v3315_v25 = vld [vmem:[#allocation5 + $0x300] sm:$0xf]  ;;  %v4211_v27 = vld [vmem:[#allocation5 + $0x30c] sm:$0xf0]  ;;  %v3188_v39 = vor.u32 %v4179_v24, %v3187_v23  ;;  %950 = vmatpush.bf16.msra.mxu0 %v2932_v34  ;;  %v4197_v2 = vld [vmem:[#allocation5 + $0x2a4] sm:$0xf]  ;;  %v3416_v7 = vor.u32 %v4233_v63, %v3413_v1 }
  0x42   :  { %v141_v28 = vld [vmem:[#allocation2] sm:$0xff]  ;;  %v143_v35 = vld [vmem:[#allocation2 + $0x10] sm:$0xff]  ;;  %v3316_v43 = vor.u32 %v4211_v27, %v3315_v25  ;;  %969 = vmatpush.bf16.msra.mxu1 %v3060_v38  ;;  %v152_v37 = vld [vmem:[#allocation2 + $0x58] sm:$0xff] }
  0x43   :  { %v145_v29 = vld [vmem:[#allocation2 + $0x20] sm:$0xff]  ;;  %v147_v40 = vld [vmem:[#allocation2 + $0x30] sm:$0xff]  ;;  %988 = vmatpush.bf16.msra.mxu2 %v3188_v39  ;;  %v156_v38 = vld [vmem:[#allocation2 + $0x78] sm:$0xff] }
  0x44   :  { %v4792_v48 = vpack.c.bf16 %v145_v29, %v141_v28  ;;  %v4796_v54 = vpack.c.bf16 %v147_v40, %v143_v35  ;;  %1007 = vmatpush.bf16.msra.mxu3 %v3316_v43  ;;  %v3269_v3 = vld [vmem:[#allocation5 + $0x2b0] sm:$0xf0]  ;;  %v4165_v4 = vld [vmem:[#allocation5 + $0x1a4] sm:$0xf]  ;;  %v150_v28 = vld [vmem:[#allocation2 + $0x48] sm:$0xff]  ;;  %v4810_v56 = vpack.c.bf16 %v156_v38, %v152_v37 }
  0x45   :  { %970 = vmatmul.bf16.vlgmr.msra.gmra.mxu1 %v4794_v53  ;;  %v3141_v5 = vld [vmem:[#allocation5 + $0x1b0] sm:$0xf0]  ;;  %1019 = vmatpush.bf16.msrb.mxu0 %v3048_v58  ;;  %v3272_v8 = vor.u32 %v4197_v2, %v3269_v3  ;;  %v4133_v9 = vld [vmem:[#allocation5 + $0xa4] sm:$0xf]  ;;  %v154_v29 = vld [vmem:[#allocation2 + $0x68] sm:$0xff] }
  0x46   :  { %951 = vmatmul.bf16.vlgmr.msra.gmra.mxu0 %v4792_v48  ;;  %1038 = vmatpush.bf16.msrb.mxu1 %v3176_v49  ;;  %v3013_v10 = vld [vmem:[#allocation5 + $0xb0] sm:$0xf0]  ;;  %v4229_v11 = vld [vmem:[#allocation5 + $0x3a4] sm:$0xf]  ;;  %v3144_v12 = vor.u32 %v4165_v4, %v3141_v5  ;;  %v4806_v50 = vpack.c.bf16 %v154_v29, %v150_v28  ;;  %v4204_v37 = vld [vmem:[#allocation5 + $0x2d4] sm:$0xf0] }
  0x47   :  { %1057 = vmatpush.bf16.msrb.mxu2 %v3304_v44  ;;  %1008 = vmatmul.bf16.vlgmr.msra.gmra.mxu3 %v4798_v57  ;;  %v3397_v13 = vld [vmem:[#allocation5 + $0x3b0] sm:$0xf0]  ;;  %v4193_v14 = vld [vmem:[#allocation5 + $0x284] sm:$0xf]  ;;  %v3016_v18 = vor.u32 %v4133_v9, %v3013_v10 }
  0x48   :  { %989 = vmatmul.bf16.vlgmr.msra.gmra.mxu2 %v4796_v54  ;;  %1076 = vmatpush.bf16.msrb.mxu3 %v3432_v59  ;;  %v3253_v15 = vld [vmem:[#allocation5 + $0x290] sm:$0xf0]  ;;  %v4161_v16 = vld [vmem:[#allocation5 + $0x184] sm:$0xf]  ;;  %v3400_v22 = vor.u32 %v4229_v11, %v3397_v13 }
  0x49   :  { %v3125_v17 = vld [vmem:[#allocation5 + $0x190] sm:$0xf0]  ;;  %1020 = vmatpush.bf16.msrb.mxu0 %v3032_v6  ;;  %v4129_v19 = vld [vmem:[#allocation5 + $0x84] sm:$0xf]  ;;  %v3256_v23 = vor.u32 %v4193_v14, %v3253_v15 }
  0x4a   :  { %1039 = vmatpush.bf16.msrb.mxu1 %v3160_v0  ;;  %v2997_v20 = vld [vmem:[#allocation5 + $0x90] sm:$0xf0]  ;;  %v4225_v21 = vld [vmem:[#allocation5 + $0x384] sm:$0xf]  ;;  %v3128_v27 = vor.u32 %v4161_v16, %v3125_v17 }
  0x4b   :  { %1058 = vmatpush.bf16.msrb.mxu2 %v3288_v60  ;;  %v3381_v24 = vld [vmem:[#allocation5 + $0x390] sm:$0xf0]  ;;  %v149_v25 = vld [vmem:[#allocation2 + $0x40] sm:$0xff]  ;;  %v3000_v35 = vor.u32 %v4129_v19, %v2997_v20  ;;  %v4208_v19 = vld [vmem:[#allocation5 + $0x2f4] sm:$0xf0] }
  0x4c   :  { %1077 = vmatpush.bf16.msrb.mxu3 %v3416_v7  ;;  %v153_v26 = vld [vmem:[#allocation2 + $0x60] sm:$0xff]  ;;  %v3237_v31 = vld [vmem:[#allocation5 + $0x270] sm:$0xf0]  ;;  %v3384_v39 = vor.u32 %v4225_v21, %v3381_v24 }
  0x4d   :  { %v4189_v30 = vld [vmem:[#allocation5 + $0x264] sm:$0xf]  ;;  %v151_v32 = vld [vmem:[#allocation2 + $0x50] sm:$0xff]  ;;  %1021 = vmatpush.bf16.msrb.mxu0 %v3016_v18  ;;  %v4804_v44 = vpack.c.bf16 %v153_v26, %v149_v25  ;;  %v3307_v18 = vld [vmem:[#allocation5 + $0x2e8] sm:$0xf] }
  0x4e   :  { %1040 = vmatpush.bf16.msrb.mxu1 %v3144_v12  ;;  %v4157_v33 = vld [vmem:[#allocation5 + $0x164] sm:$0xf]  ;;  %v3109_v34 = vld [vmem:[#allocation5 + $0x170] sm:$0xf0]  ;;  %v3240_v40 = vor.u32 %v4189_v30, %v3237_v31  ;;  %v3308_v30 = vor.u32 %v4208_v19, %v3307_v18  ;;  %v3051_v31 = vld [vmem:[#allocation5 + $0xe8] sm:$0xf] }
  0x4f   :  { %1059 = vmatpush.bf16.msrb.mxu2 %v3272_v8  ;;  %v155_v36 = vld [vmem:[#allocation2 + $0x70] sm:$0xff]  ;;  %v4125_v41 = vld [vmem:[#allocation5 + $0x64] sm:$0xf]  ;;  %v3112_v45 = vor.u32 %v4157_v33, %v3109_v34  ;;  %v3435_v33 = vld [vmem:[#allocation5 + $0x3e8] sm:$0xf] }
  0x50   :  { %1078 = vmatpush.bf16.msrb.mxu3 %v3400_v22  ;;  %v2981_v42 = vld [vmem:[#allocation5 + $0x70] sm:$0xf0]  ;;  %v4221_v43 = vld [vmem:[#allocation5 + $0x364] sm:$0xf]  ;;  %v4808_v51 = vpack.c.bf16 %v155_v36, %v151_v32  ;;  %v3179_v22 = vld [vmem:[#allocation5 + $0x1e8] sm:$0xf] }
  0x51   :  { %v3365_v46 = vld [vmem:[#allocation5 + $0x370] sm:$0xf0]  ;;  %v4185_v47 = vld [vmem:[#allocation5 + $0x244] sm:$0xf]  ;;  %1022 = vmatpush.bf16.msrb.mxu0 %v3000_v35  ;;  %v2984_v58 = vor.u32 %v4125_v41, %v2981_v42  ;;  %v4144_v32 = vld [vmem:[#allocation5 + $0xf4] sm:$0xf0] }
  0x52   :  { %1041 = vmatpush.bf16.msrb.mxu1 %v3128_v27  ;;  %v3221_v49 = vld [vmem:[#allocation5 + $0x250] sm:$0xf0]  ;;  %v4153_v52 = vld [vmem:[#allocation5 + $0x144] sm:$0xf]  ;;  %v3368_v59 = vor.u32 %v4221_v43, %v3365_v46  ;;  %v4240_v35 = vld [vmem:[#allocation5 + $0x3f4] sm:$0xf0] }
  0x53   :  { %1060 = vmatpush.bf16.msrb.mxu2 %v3256_v23  ;;  %v3093_v55 = vld [vmem:[#allocation5 + $0x150] sm:$0xf0]  ;;  %v3224_v60 = vor.u32 %v4185_v47, %v3221_v49  ;;  %v4121_v61 = vld [vmem:[#allocation5 + $0x44] sm:$0xf]  ;;  %v4176_v23 = vld [vmem:[#allocation5 + $0x1f4] sm:$0xf0]  ;;  %v3436_v43 = vor.u32 %v4240_v35, %v3435_v33 }
  0x54   :  { %1079 = vmatpush.bf16.msrb.mxu3 %v3384_v39  ;;  %v2965_v62 = vld [vmem:[#allocation5 + $0x50] sm:$0xf0]  ;;  %v4217_v63 = vld [vmem:[#allocation5 + $0x344] sm:$0xf]  ;;  %v3096_v0 = vor.u32 %v4153_v52, %v3093_v55  ;;  %v3180_v34 = vor.u32 %v4176_v23, %v3179_v22  ;;  %v3291_v36 = vld [vmem:[#allocation5 + $0x2c8] sm:$0xf] }
  0x55   :  { %v3349_v1 = vld [vmem:[#allocation5 + $0x350] sm:$0xf0]  ;;  %v4181_v2 = vld [vmem:[#allocation5 + $0x224] sm:$0xf]  ;;  %975 = vmatmul.bf16.gmra.mxu1 %v4806_v50  ;;  %1023 = vmatpush.bf16.msrb.mxu0 %v2984_v58  ;;  %v2968_v6 = vor.u32 %v4121_v61, %v2965_v62  ;;  %v3035_v41 = vld [vmem:[#allocation5 + $0xc8] sm:$0xf] }
  0x56   :  { %956 = vmatmul.bf16.gmra.mxu0 %v4804_v44  ;;  %1042 = vmatpush.bf16.msrb.mxu1 %v3112_v45  ;;  %v3205_v3 = vld [vmem:[#allocation5 + $0x230] sm:$0xf0]  ;;  %v4149_v4 = vld [vmem:[#allocation5 + $0x124] sm:$0xf]  ;;  %v3352_v8 = vor.u32 %v4217_v63, %v3349_v1  ;;  %v4140_v42 = vld [vmem:[#allocation5 + $0xd4] sm:$0xf0]  ;;  %v3292_v45 = vor.u32 %v4204_v37, %v3291_v36 }
  0x57   :  { %1061 = vmatpush.bf16.msrb.mxu2 %v3240_v40  ;;  %v3077_v5 = vld [vmem:[#allocation5 + $0x130] sm:$0xf0]  ;;  %1013 = vmatmul.bf16.gmra.mxu3 %v4810_v56  ;;  %v4117_v7 = vld [vmem:[#allocation5 + $0x24] sm:$0xf]  ;;  %v3208_v9 = vor.u32 %v4181_v2, %v3205_v3  ;;  %v3052_v40 = vor.u32 %v4144_v32, %v3051_v31  ;;  %v3163_v46 = vld [vmem:[#allocation5 + $0x1c8] sm:$0xf] }
  0x58   :  { %994 = vmatmul.bf16.gmra.mxu2 %v4808_v51  ;;  %1080 = vmatpush.bf16.msrb.mxu3 %v3368_v59  ;;  %v2949_v10 = vld [vmem:[#allocation5 + $0x30] sm:$0xf0]  ;;  %v4213_v11 = vld [vmem:[#allocation5 + $0x324] sm:$0xf]  ;;  %v3080_v13 = vor.u32 %v4149_v4, %v3077_v5  ;;  %v4172_v47 = vld [vmem:[#allocation5 + $0x1d4] sm:$0xf0]  ;;  %v3036_v59 = vor.u32 %v4140_v42, %v3035_v41 }
  0x59   :  { %v3333_v12 = vld [vmem:[#allocation5 + $0x330] sm:$0xf0]  ;;  %v4177_v14 = vld [vmem:[#allocation5 + $0x204] sm:$0xf]  ;;  %1024 = vmatpush.bf16.msrb.mxu0 %v2968_v6  ;;  %v2952_v20 = vor.u32 %v4117_v7, %v2949_v10  ;;  %v3419_v49 = vld [vmem:[#allocation5 + $0x3c8] sm:$0xf] }
  0x5a   :  { %1043 = vmatpush.bf16.msrb.mxu1 %v3096_v0  ;;  %v3189_v15 = vld [vmem:[#allocation5 + $0x210] sm:$0xf0]  ;;  %v4145_v16 = vld [vmem:[#allocation5 + $0x104] sm:$0xf]  ;;  %v3336_v24 = vor.u32 %v4213_v11, %v3333_v12  ;;  %v4236_v52 = vld [vmem:[#allocation5 + $0x3d4] sm:$0xf0] }
  0x5b   :  { %1062 = vmatpush.bf16.msrb.mxu2 %v3224_v60  ;;  %v3061_v17 = vld [vmem:[#allocation5 + $0x110] sm:$0xf0]  ;;  %v4113_v21 = vld [vmem:[#allocation5 + $0x4] sm:$0xf]  ;;  %v3192_v25 = vor.u32 %v4177_v14, %v3189_v15  ;;  %v3275_v55 = vld [vmem:[#allocation5 + $0x2a8] sm:$0xf]  ;;  %v3164_v60 = vor.u32 %v4172_v47, %v3163_v46  ;;  %v3420_v63 = vor.u32 %v4236_v52, %v3419_v49 }
  0x5c   :  { %1081 = vmatpush.bf16.msrb.mxu3 %v3352_v8  ;;  %v2933_v26 = vld [vmem:[#allocation5 + $0x10] sm:$0xf0]  ;;  %v4209_v27 = vld [vmem:[#allocation5 + $0x304] sm:$0xf]  ;;  %v3064_v29 = vor.u32 %v4145_v16, %v3061_v17  ;;  %v4200_v58 = vld [vmem:[#allocation5 + $0x2b4] sm:$0xf0] }
  0x5d   :  { %v3317_v28 = vld [vmem:[#allocation5 + $0x310] sm:$0xf0]  ;;  %1025 = vmatpush.bf16.msrb.mxu0 %v2952_v20  ;;  %v2936_v38 = vor.u32 %v4113_v21, %v2933_v26  ;;  %v3019_v61 = vld [vmem:[#allocation5 + $0xa8] sm:$0xf]  ;;  %v4136_v62 = vld [vmem:[#allocation5 + $0xb4] sm:$0xf0]  ;;  %v3276_v0 = vor.u32 %v4200_v58, %v3275_v55 }
  0x5e   :  { %1044 = vmatpush.bf16.msrb.mxu1 %v3080_v13  ;;  %v3320_v39 = vor.u32 %v4209_v27, %v3317_v28  ;;  %v3147_v1 = vld [vmem:[#allocation5 + $0x1a8] sm:$0xf]  ;;  %v4168_v2 = vld [vmem:[#allocation5 + $0x1b4] sm:$0xf0]  ;;  %v3020_v7 = vor.u32 %v4136_v62, %v3019_v61 }
  0x5f   :  { %1063 = vmatpush.bf16.msrb.mxu2 %v3208_v9  ;;  %v3403_v3 = vld [vmem:[#allocation5 + $0x3a8] sm:$0xf]  ;;  %v4232_v4 = vld [vmem:[#allocation5 + $0x3b4] sm:$0xf0]  ;;  %v3148_v8 = vor.u32 %v4168_v2, %v3147_v1 }
  0x60   :  { %1082 = vmatpush.bf16.msrb.mxu3 %v3336_v24  ;;  %v3259_v5 = vld [vmem:[#allocation5 + $0x288] sm:$0xf]  ;;  %v4196_v6 = vld [vmem:[#allocation5 + $0x294] sm:$0xf0]  ;;  %v3404_v11 = vor.u32 %v4232_v4, %v3403_v3 }
  0x61   :  { %1026 = vmatpush.bf16.msrb.mxu0 %v2936_v38  ;;  %v3003_v9 = vld [vmem:[#allocation5 + $0x88] sm:$0xf]  ;;  %v4132_v10 = vld [vmem:[#allocation5 + $0x94] sm:$0xf0]  ;;  %v3260_v12 = vor.u32 %v4196_v6, %v3259_v5 }
  0x62   :  { %1045 = vmatpush.bf16.msrb.mxu1 %v3064_v29  ;;  %v3131_v13 = vld [vmem:[#allocation5 + $0x188] sm:$0xf]  ;;  %v4164_v14 = vld [vmem:[#allocation5 + $0x194] sm:$0xf0]  ;;  %v3004_v19 = vor.u32 %v4132_v10, %v3003_v9 }
  0x63   :  { %1064 = vmatpush.bf16.msrb.mxu2 %v3192_v25  ;;  %v3387_v15 = vld [vmem:[#allocation5 + $0x388] sm:$0xf]  ;;  %v4228_v16 = vld [vmem:[#allocation5 + $0x394] sm:$0xf0]  ;;  %v3132_v20 = vor.u32 %v4164_v14, %v3131_v13  ;;  %v3053_v13 = vld [vmem:[#allocation5 + $0xf8] sm:$0xf0] }
  0x64   :  { %1083 = vmatpush.bf16.msrb.mxu3 %v3320_v39  ;;  %v3243_v17 = vld [vmem:[#allocation5 + $0x268] sm:$0xf]  ;;  %v4192_v18 = vld [vmem:[#allocation5 + $0x274] sm:$0xf0]  ;;  %v3388_v23 = vor.u32 %v4228_v16, %v3387_v15  ;;  %v4174_v14 = vld [vmem:[#allocation5 + $0x1ec] sm:$0xf] }
  0x65   :  { %1095 = vmatpush.bf16.msra.mxu0 %v3052_v40  ;;  %1046 = vmatmul.bf16.vlgmr.msrb.gmra.mxu1 %v4794_v53  ;;  %v2987_v21 = vld [vmem:[#allocation5 + $0x68] sm:$0xf]  ;;  %v4128_v22 = vld [vmem:[#allocation5 + $0x74] sm:$0xf0]  ;;  %v3244_v24 = vor.u32 %v4192_v18, %v3243_v17  ;;  %v3181_v15 = vld [vmem:[#allocation5 + $0x1f8] sm:$0xf0] }
  0x66   :  { %1114 = vmatpush.bf16.msra.mxu1 %v3180_v34  ;;  %1027 = vmatmul.bf16.vlgmr.msrb.gmra.mxu0 %v4792_v48  ;;  %v3115_v25 = vld [vmem:[#allocation5 + $0x168] sm:$0xf]  ;;  %v4160_v26 = vld [vmem:[#allocation5 + $0x174] sm:$0xf0]  ;;  %v2988_v31 = vor.u32 %v4128_v22, %v2987_v21  ;;  %v4238_v16 = vld [vmem:[#allocation5 + $0x3ec] sm:$0xf] }
  0x67   :  { %1133 = vmatpush.bf16.msra.mxu2 %v3308_v30  ;;  %1084 = vmatmul.bf16.vlgmr.msrb.gmra.mxu3 %v4798_v57  ;;  %v3371_v27 = vld [vmem:[#allocation5 + $0x368] sm:$0xf]  ;;  %v4224_v28 = vld [vmem:[#allocation5 + $0x374] sm:$0xf0]  ;;  %v3116_v32 = vor.u32 %v4160_v26, %v3115_v25  ;;  %v3437_v17 = vld [vmem:[#allocation5 + $0x3f8] sm:$0xf0] }
  0x68   :  { %1152 = vmatpush.bf16.msra.mxu3 %v3436_v43  ;;  %1065 = vmatmul.bf16.vlgmr.msrb.gmra.mxu2 %v4796_v54  ;;  %v3227_v29 = vld [vmem:[#allocation5 + $0x248] sm:$0xf]  ;;  %v4188_v30 = vld [vmem:[#allocation5 + $0x254] sm:$0xf0]  ;;  %v3372_v35 = vor.u32 %v4224_v28, %v3371_v27  ;;  %v3293_v21 = vld [vmem:[#allocation5 + $0x2d8] sm:$0xf0]  ;;  %v3440_v25 = vor.u32 %v4238_v16, %v3437_v17 }
  0x69   :  { %1096 = vmatpush.bf16.msra.mxu0 %v3036_v59  ;;  %v2971_v33 = vld [vmem:[#allocation5 + $0x48] sm:$0xf]  ;;  %v4124_v34 = vld [vmem:[#allocation5 + $0x54] sm:$0xf0]  ;;  %v3228_v36 = vor.u32 %v4188_v30, %v3227_v29  ;;  %v4138_v26 = vld [vmem:[#allocation5 + $0xcc] sm:$0xf] }
  0x6a   :  { %1115 = vmatpush.bf16.msra.mxu1 %v3164_v60  ;;  %v3099_v37 = vld [vmem:[#allocation5 + $0x148] sm:$0xf]  ;;  %v4156_v38 = vld [vmem:[#allocation5 + $0x154] sm:$0xf0]  ;;  %v2972_v43 = vor.u32 %v4124_v34, %v2971_v33  ;;  %v3037_v27 = vld [vmem:[#allocation5 + $0xd8] sm:$0xf0] }
  0x6b   :  { %1134 = vmatpush.bf16.msra.mxu2 %v3292_v45  ;;  %v3355_v39 = vld [vmem:[#allocation5 + $0x348] sm:$0xf]  ;;  %v4220_v40 = vld [vmem:[#allocation5 + $0x354] sm:$0xf0]  ;;  %v3100_v45 = vor.u32 %v4156_v38, %v3099_v37  ;;  %v4170_v29 = vld [vmem:[#allocation5 + $0x1cc] sm:$0xf] }
  0x6c   :  { %1153 = vmatpush.bf16.msra.mxu3 %v3420_v63  ;;  %v3211_v41 = vld [vmem:[#allocation5 + $0x228] sm:$0xf]  ;;  %v4184_v42 = vld [vmem:[#allocation5 + $0x234] sm:$0xf0]  ;;  %v3356_v49 = vor.u32 %v4220_v40, %v3355_v39  ;;  %v4206_v63 = vld [vmem:[#allocation5 + $0x2ec] sm:$0xf] }
  0x6d   :  { %1097 = vmatpush.bf16.msra.mxu0 %v3020_v7  ;;  %v2955_v46 = vld [vmem:[#allocation5 + $0x28] sm:$0xf]  ;;  %v4120_v47 = vld [vmem:[#allocation5 + $0x34] sm:$0xf0]  ;;  %v3212_v52 = vor.u32 %v4184_v42, %v3211_v41  ;;  %v3165_v30 = vld [vmem:[#allocation5 + $0x1d8] sm:$0xf0] }
  0x6e   :  { %1116 = vmatpush.bf16.msra.mxu1 %v3148_v8  ;;  %v3083_v55 = vld [vmem:[#allocation5 + $0x128] sm:$0xf]  ;;  %v4152_v58 = vld [vmem:[#allocation5 + $0x134] sm:$0xf0]  ;;  %v2956_v1 = vor.u32 %v4120_v47, %v2955_v46  ;;  %v3421_v33 = vld [vmem:[#allocation5 + $0x3d8] sm:$0xf0]  ;;  %v3168_v38 = vor.u32 %v4170_v29, %v3165_v30 }
  0x6f   :  { %1135 = vmatpush.bf16.msra.mxu2 %v3276_v0  ;;  %v3339_v59 = vld [vmem:[#allocation5 + $0x328] sm:$0xf]  ;;  %v4216_v60 = vld [vmem:[#allocation5 + $0x334] sm:$0xf0]  ;;  %v3309_v0 = vld [vmem:[#allocation5 + $0x2f8] sm:$0xf0]  ;;  %v3084_v2 = vor.u32 %v4152_v58, %v3083_v55 }
  0x70   :  { %1154 = vmatpush.bf16.msra.mxu3 %v3404_v11  ;;  %v3195_v61 = vld [vmem:[#allocation5 + $0x208] sm:$0xf]  ;;  %v4180_v62 = vld [vmem:[#allocation5 + $0x214] sm:$0xf0]  ;;  %v3340_v6 = vor.u32 %v4216_v60, %v3339_v59  ;;  %v3312_v11 = vor.u32 %v4206_v63, %v3309_v0  ;;  %v4198_v34 = vld [vmem:[#allocation5 + $0x2ac] sm:$0xf] }
  0x71   :  { %1098 = vmatpush.bf16.msra.mxu0 %v3004_v19  ;;  %v2939_v3 = vld [vmem:[#allocation5 + $0x8] sm:$0xf]  ;;  %v4116_v4 = vld [vmem:[#allocation5 + $0x14] sm:$0xf0]  ;;  %v3196_v7 = vor.u32 %v4180_v62, %v3195_v61  ;;  %v3021_v37 = vld [vmem:[#allocation5 + $0xb8] sm:$0xf0] }
  0x72   :  { %1117 = vmatpush.bf16.msra.mxu1 %v3132_v20  ;;  %v3067_v5 = vld [vmem:[#allocation5 + $0x108] sm:$0xf]  ;;  %v4148_v8 = vld [vmem:[#allocation5 + $0x114] sm:$0xf0]  ;;  %v2940_v18 = vor.u32 %v4116_v4, %v2939_v3  ;;  %v4202_v20 = vld [vmem:[#allocation5 + $0x2cc] sm:$0xf] }
  0x73   :  { %1136 = vmatpush.bf16.msra.mxu2 %v3260_v12  ;;  %v3323_v9 = vld [vmem:[#allocation5 + $0x308] sm:$0xf]  ;;  %v4212_v10 = vld [vmem:[#allocation5 + $0x314] sm:$0xf0]  ;;  %v4142_v12 = vld [vmem:[#allocation5 + $0xec] sm:$0xf]  ;;  %v3068_v19 = vor.u32 %v4148_v8, %v3067_v5  ;;  %v3296_v28 = vor.u32 %v4202_v20, %v3293_v21 }
  0x74   :  { %1155 = vmatpush.bf16.msra.mxu3 %v3388_v23  ;;  %v3324_v22 = vor.u32 %v4212_v10, %v3323_v9  ;;  %v3056_v23 = vor.u32 %v4142_v12, %v3053_v13  ;;  %v4166_v40 = vld [vmem:[#allocation5 + $0x1ac] sm:$0xf]  ;;  %v3149_v41 = vld [vmem:[#allocation5 + $0x1b8] sm:$0xf0] }
  0x75   :  { %1099 = vmatpush.bf16.msra.mxu0 %v2988_v31  ;;  %1051 = vmatmul.bf16.gmra.mxu1 %v4806_v50  ;;  %v3040_v31 = vor.u32 %v4138_v26, %v3037_v27  ;;  %v3405_v46 = vld [vmem:[#allocation5 + $0x3b8] sm:$0xf0]  ;;  %v4194_v47 = vld [vmem:[#allocation5 + $0x28c] sm:$0xf]  ;;  %v3152_v58 = vor.u32 %v4166_v40, %v3149_v41 }
  0x76   :  { %1118 = vmatpush.bf16.msra.mxu1 %v3116_v32  ;;  %1032 = vmatmul.bf16.gmra.mxu0 %v4804_v44  ;;  %v4234_v32 = vld [vmem:[#allocation5 + $0x3cc] sm:$0xf]  ;;  %v3005_v55 = vld [vmem:[#allocation5 + $0x98] sm:$0xf0] }
  0x77   :  { %1137 = vmatpush.bf16.msra.mxu2 %v3244_v24  ;;  %1089 = vmatmul.bf16.gmra.mxu3 %v4810_v56  ;;  %v3184_v24 = vor.u32 %v4174_v14, %v3181_v15  ;;  %v3424_v39 = vor.u32 %v4234_v32, %v3421_v33  ;;  %v4162_v60 = vld [vmem:[#allocation5 + $0x18c] sm:$0xf]  ;;  %v3133_v61 = vld [vmem:[#allocation5 + $0x198] sm:$0xf0] }
  0x78   :  { %1156 = vmatpush.bf16.msra.mxu3 %v3372_v35  ;;  %1070 = vmatmul.bf16.gmra.mxu2 %v4808_v51  ;;  %v3277_v35 = vld [vmem:[#allocation5 + $0x2b8] sm:$0xf0]  ;;  %v4226_v0 = vld [vmem:[#allocation5 + $0x38c] sm:$0xf] }
  0x79   :  { %1100 = vmatpush.bf16.msra.mxu0 %v2972_v43  ;;  %v3280_v42 = vor.u32 %v4198_v34, %v3277_v35  ;;  %v3245_v3 = vld [vmem:[#allocation5 + $0x278] sm:$0xf0]  ;;  %v4126_v4 = vld [vmem:[#allocation5 + $0x6c] sm:$0xf] }
  0x7a   :  { %1119 = vmatpush.bf16.msra.mxu1 %v3100_v45  ;;  %v4230_v45 = vld [vmem:[#allocation5 + $0x3ac] sm:$0xf]  ;;  %v2989_v5 = vld [vmem:[#allocation5 + $0x78] sm:$0xf0] }
  0x7b   :  { %1138 = vmatpush.bf16.msra.mxu2 %v3228_v36  ;;  %v4134_v36 = vld [vmem:[#allocation5 + $0xac] sm:$0xf]  ;;  %v3408_v59 = vor.u32 %v4230_v45, %v3405_v46  ;;  %v3117_v9 = vld [vmem:[#allocation5 + $0x178] sm:$0xf0] }
  0x7c   :  { %1157 = vmatpush.bf16.msra.mxu3 %v3356_v49  ;;  %v3024_v43 = vor.u32 %v4134_v36, %v3021_v37  ;;  %v3261_v49 = vld [vmem:[#allocation5 + $0x298] sm:$0xf0]  ;;  %v4158_v8 = vld [vmem:[#allocation5 + $0x16c] sm:$0xf] }
  0x7d   :  { %1101 = vmatpush.bf16.msra.mxu0 %v2956_v1  ;;  %v3264_v62 = vor.u32 %v4194_v47, %v3261_v49  ;;  %v3389_v1 = vld [vmem:[#allocation5 + $0x398] sm:$0xf0]  ;;  %v4222_v12 = vld [vmem:[#allocation5 + $0x36c] sm:$0xf] }
  0x7e   :  { %1120 = vmatpush.bf16.msra.mxu1 %v3084_v2  ;;  %v4190_v2 = vld [vmem:[#allocation5 + $0x26c] sm:$0xf]  ;;  %v3373_v13 = vld [vmem:[#allocation5 + $0x378] sm:$0xf0] }
  0x7f   :  { %1139 = vmatpush.bf16.msra.mxu2 %v3212_v52  ;;  %v4130_v52 = vld [vmem:[#allocation5 + $0x8c] sm:$0xf]  ;;  %v3248_v10 = vor.u32 %v4190_v2, %v3245_v3  ;;  %v3229_v15 = vld [vmem:[#allocation5 + $0x258] sm:$0xf0]  ;;  %v3523_v2 = vld [vmem:[#allocation8 + $0xa0] sm:$0xf] }
  0x80   :  { %1158 = vmatpush.bf16.msra.mxu3 %v3340_v6  ;;  %v3008_v63 = vor.u32 %v4130_v52, %v3005_v55  ;;  %v3136_v6 = vor.u32 %v4162_v60, %v3133_v61  ;;  %v4186_v14 = vld [vmem:[#allocation5 + $0x24c] sm:$0xf]  ;;  %v2973_v17 = vld [vmem:[#allocation5 + $0x58] sm:$0xf0]  ;;  %v3539_v61 = vld [vmem:[#allocation8 + $0xc0] sm:$0xf] }
  0x81   :  { %1102 = vmatpush.bf16.msra.mxu0 %v2940_v18  ;;  %v4122_v16 = vld [vmem:[#allocation5 + $0x4c] sm:$0xf]  ;;  %v3120_v18 = vor.u32 %v4158_v8, %v3117_v9  ;;  %v3101_v21 = vld [vmem:[#allocation5 + $0x158] sm:$0xf0]  ;;  %v4263_v3 = vld [vmem:[#allocation8 + $0xac] sm:$0xf0] }
  0x82   :  { %1121 = vmatpush.bf16.msra.mxu1 %v3068_v19  ;;  %v3376_v19 = vor.u32 %v4222_v12, %v3373_v13  ;;  %v4154_v20 = vld [vmem:[#allocation5 + $0x14c] sm:$0xf]  ;;  %v3213_v27 = vld [vmem:[#allocation5 + $0x238] sm:$0xf0]  ;;  %v3491_v8 = vld [vmem:[#allocation8 + $0x60] sm:$0xf] }
  0x83   :  { %1140 = vmatpush.bf16.msra.mxu2 %v3196_v7  ;;  %v3392_v7 = vor.u32 %v4226_v0, %v3389_v1  ;;  %v4182_v26 = vld [vmem:[#allocation5 + $0x22c] sm:$0xf]  ;;  %v2957_v29 = vld [vmem:[#allocation5 + $0x38] sm:$0xf0]  ;;  %v3104_v30 = vor.u32 %v4154_v20, %v3101_v21  ;;  %v4255_v9 = vld [vmem:[#allocation8 + $0x6c] sm:$0xf0] }
  0x84   :  { %1159 = vmatpush.bf16.msra.mxu3 %v3324_v22  ;;  %v3232_v22 = vor.u32 %v4186_v14, %v3229_v15  ;;  %v4150_v32 = vld [vmem:[#allocation5 + $0x12c] sm:$0xf]  ;;  %v3085_v33 = vld [vmem:[#allocation5 + $0x138] sm:$0xf0]  ;;  %v3216_v34 = vor.u32 %v4182_v26, %v3213_v27  ;;  %v4251_v12 = vld [vmem:[#allocation8 + $0x4c] sm:$0xf0] }
  0x85   :  { %1171 = vmatpush.bf16.msrb.mxu0 %v3056_v23  ;;  %1122 = vmatmul.bf16.vlgmr.msra.gmra.mxu1 %v4794_v53  ;;  %v2976_v23 = vor.u32 %v4122_v16, %v2973_v17  ;;  %v4214_v36 = vld [vmem:[#allocation5 + $0x32c] sm:$0xf]  ;;  %v3341_v37 = vld [vmem:[#allocation5 + $0x338] sm:$0xf0]  ;;  %v3088_v45 = vor.u32 %v4150_v32, %v3085_v33  ;;  %v3459_v14 = vld [vmem:[#allocation8 + $0x20] sm:$0xf] }
  0x86   :  { %1190 = vmatpush.bf16.msrb.mxu1 %v3184_v24  ;;  %1103 = vmatmul.bf16.vlgmr.msra.gmra.mxu0 %v4792_v48  ;;  %v4218_v24 = vld [vmem:[#allocation5 + $0x34c] sm:$0xf]  ;;  %v2941_v41 = vld [vmem:[#allocation5 + $0x18] sm:$0xf0]  ;;  %v3344_v46 = vor.u32 %v4214_v36, %v3341_v37  ;;  %v4247_v15 = vld [vmem:[#allocation8 + $0x2c] sm:$0xf0] }
  0x87   :  { %1209 = vmatpush.bf16.msrb.mxu2 %v3312_v11  ;;  %1160 = vmatmul.bf16.vlgmr.msra.gmra.mxu3 %v4798_v57  ;;  %v2992_v11 = vor.u32 %v4126_v4, %v2989_v5  ;;  %v4114_v40 = vld [vmem:[#allocation5 + $0xc] sm:$0xf]  ;;  %v3069_v55 = vld [vmem:[#allocation5 + $0x118] sm:$0xf0]  ;;  %v3524_v4 = vor.u32 %v4263_v3, %v3523_v2  ;;  %v3507_v5 = vld [vmem:[#allocation8 + $0x80] sm:$0xf] }
  0x88   :  { %1228 = vmatpush.bf16.msrb.mxu3 %v3440_v25  ;;  %1141 = vmatmul.bf16.vlgmr.msra.gmra.mxu2 %v4796_v54  ;;  %v3357_v25 = vld [vmem:[#allocation5 + $0x358] sm:$0xf0]  ;;  %v4146_v47 = vld [vmem:[#allocation5 + $0x10c] sm:$0xf]  ;;  %v2944_v52 = vor.u32 %v4114_v40, %v2941_v41  ;;  %v3443_v16 = vld [vmem:[#allocation8] sm:$0xf] }
  0x89   :  { %1172 = vmatpush.bf16.msrb.mxu0 %v3040_v31  ;;  %v3360_v31 = vor.u32 %v4218_v24, %v3357_v25  ;;  %v4303_v17 = vld [vmem:[#allocation8 + $0x1ec] sm:$0xf0]  ;;  %v3557_v20 = vld [vmem:[#allocation8 + $0xf0] sm:$0xf0]  ;;  %v4840_v25 = vld [vmem:[#allocation7] sm:$0xf] }
  0x8a   :  { %1191 = vmatpush.bf16.msrb.mxu1 %v3168_v38  ;;  %v4178_v38 = vld [vmem:[#allocation5 + $0x20c] sm:$0xf]  ;;  %v4295_v26 = vld [vmem:[#allocation8 + $0x1ac] sm:$0xf0]  ;;  %v4261_v27 = vld [vmem:[#allocation8 + $0xa4] sm:$0xf] }
  0x8b   :  { %1210 = vmatpush.bf16.msrb.mxu2 %v3296_v28  ;;  %v4118_v28 = vld [vmem:[#allocation5 + $0x2c] sm:$0xf]  ;;  %v3477_v2 = vld [vmem:[#allocation8 + $0x50] sm:$0xf0] }
  0x8c   :  { %1229 = vmatpush.bf16.msrb.mxu3 %v3424_v39  ;;  %v2960_v35 = vor.u32 %v4118_v28, %v2957_v29  ;;  %v3197_v39 = vld [vmem:[#allocation5 + $0x218] sm:$0xf0]  ;;  %v4843_v28 = vperm.slane %v4840_v25, 0 }
  0x8d   :  { %1173 = vmatpush.bf16.msrb.mxu0 %v3024_v43  ;;  %v4271_v43 = vld [vmem:[#allocation8 + $0xec] sm:$0xf0]  ;;  %v3200_v49 = vor.u32 %v4178_v38, %v3197_v39  ;;  %v4257_v38 = vld [vmem:[#allocation8 + $0x84] sm:$0xf]  ;;  %v3509_v39 = vld [vmem:[#allocation8 + $0x90] sm:$0xf0] }
  0x8e   :  { %1192 = vmatpush.bf16.msrb.mxu1 %v3152_v58  ;;  %v4210_v58 = vld [vmem:[#allocation5 + $0x30c] sm:$0xf]  ;;  %v3512_v40 = vor.u32 %v4257_v38, %v3509_v39  ;;  %v4331_v38 = vld [vmem:[#allocation8 + $0x2cc] sm:$0xf0]  ;;  %v4297_v39 = vld [vmem:[#allocation8 + $0x1c4] sm:$0xf] }
  0x8f   :  { %1211 = vmatpush.bf16.msrb.mxu2 %v3280_v42  ;;  %v3555_v42 = vld [vmem:[#allocation8 + $0xe0] sm:$0xf] }
  0x90   :  { %1230 = vmatpush.bf16.msrb.mxu3 %v3408_v59  ;;  %v3325_v59 = vld [vmem:[#allocation5 + $0x318] sm:$0xf0]  ;;  %v3556_v60 = vor.u32 %v4271_v43, %v3555_v42  ;;  %v3619_v42 = vld [vmem:[#allocation8 + $0x160] sm:$0xf]  ;;  %v4287_v43 = vld [vmem:[#allocation8 + $0x16c] sm:$0xf0] }
  0x91   :  { %1174 = vmatpush.bf16.msrb.mxu0 %v3008_v63  ;;  %v3072_v63 = vor.u32 %v4146_v47, %v3069_v55  ;;  %v3328_v0 = vor.u32 %v4210_v58, %v3325_v59  ;;  %v3493_v55 = vld [vmem:[#allocation8 + $0x70] sm:$0xf0] }
  0x92   :  { %1193 = vmatpush.bf16.msrb.mxu1 %v3136_v6  ;;  %v4259_v6 = vld [vmem:[#allocation8 + $0x8c] sm:$0xf0] }
  0x93   :  { %1212 = vmatpush.bf16.msrb.mxu2 %v3264_v62  ;;  %v4267_v62 = vld [vmem:[#allocation8 + $0xcc] sm:$0xf0] }
  0x94   :  { %1231 = vmatpush.bf16.msrb.mxu3 %v3392_v7  ;;  %v3540_v1 = vor.u32 %v4267_v62, %v3539_v61  ;;  %v3508_v7 = vor.u32 %v4259_v6, %v3507_v5  ;;  %v3603_v61 = vld [vmem:[#allocation8 + $0x140] sm:$0xf]  ;;  %v4283_v62 = vld [vmem:[#allocation8 + $0x14c] sm:$0xf0] }
  0x95   :  { %1175 = vmatpush.bf16.msrb.mxu0 %v2992_v11  ;;  %1127 = vmatmul.bf16.gmra.mxu1 %v4806_v50  ;;  %v3475_v11 = vld [vmem:[#allocation8 + $0x40] sm:$0xf] }
  0x96   :  { %1194 = vmatpush.bf16.msrb.mxu1 %v3120_v18  ;;  %1108 = vmatmul.bf16.gmra.mxu0 %v4804_v44  ;;  %v3476_v13 = vor.u32 %v4251_v12, %v3475_v11  ;;  %v4269_v18 = vld [vmem:[#allocation8 + $0xe4] sm:$0xf]  ;;  %v3587_v6 = vld [vmem:[#allocation8 + $0x120] sm:$0xf] }
  0x97   :  { %1213 = vmatpush.bf16.msrb.mxu2 %v3248_v10  ;;  %1165 = vmatmul.bf16.gmra.mxu3 %v4810_v56  ;;  %v3492_v10 = vor.u32 %v4255_v9, %v3491_v8  ;;  %v3560_v21 = vor.u32 %v4269_v18, %v3557_v20  ;;  %v4245_v8 = vld [vmem:[#allocation8 + $0x24] sm:$0xf] }
  0x98   :  { %1232 = vmatpush.bf16.msrb.mxu3 %v3376_v19  ;;  %1146 = vmatmul.bf16.gmra.mxu2 %v4808_v51 }
  0x99   :  { %1176 = vmatpush.bf16.msrb.mxu0 %v2976_v23  ;;  %v4299_v23 = vld [vmem:[#allocation8 + $0x1cc] sm:$0xf0] }
  0x9a   :  { %1195 = vmatpush.bf16.msrb.mxu1 %v3104_v30 }
  0x9b   :  { %1214 = vmatpush.bf16.msrb.mxu2 %v3232_v22  ;;  %v3667_v22 = vld [vmem:[#allocation8 + $0x1c0] sm:$0xf] }
  0x9c   :  { %1233 = vmatpush.bf16.msrb.mxu3 %v3360_v31  ;;  %v3668_v24 = vor.u32 %v4299_v23, %v3667_v22  ;;  %v3525_v31 = vld [vmem:[#allocation8 + $0xb0] sm:$0xf0] }
  0x9d   :  { %1177 = vmatpush.bf16.msrb.mxu0 %v2960_v35  ;;  %v3528_v33 = vor.u32 %v4261_v27, %v3525_v31  ;;  %v4291_v35 = vld [vmem:[#allocation8 + $0x18c] sm:$0xf0]  ;;  %v3563_v31 = vld [vmem:[#allocation8 + $0xe8] sm:$0xf] }
  0x9e   :  { %1196 = vmatpush.bf16.msrb.mxu1 %v3088_v45  ;;  %v4253_v45 = vld [vmem:[#allocation8 + $0x64] sm:$0xf] }
  0x9f   :  { %1215 = vmatpush.bf16.msrb.mxu2 %v3216_v34  ;;  %v3635_v34 = vld [vmem:[#allocation8 + $0x180] sm:$0xf]  ;;  %v3496_v59 = vor.u32 %v4253_v45, %v3493_v55 }
  0xa0   :  { %1234 = vmatpush.bf16.msrb.mxu3 %v3344_v46  ;;  %v3636_v37 = vor.u32 %v4291_v35, %v3635_v34 }
  0xa1   :  { %1178 = vmatpush.bf16.msrb.mxu0 %v2944_v52  ;;  %v3620_v52 = vor.u32 %v4287_v43, %v3619_v42  ;;  %v3669_v42 = vld [vmem:[#allocation8 + $0x1d0] sm:$0xf0]  ;;  %v3547_v43 = vld [vmem:[#allocation8 + $0xc8] sm:$0xf] }
  0xa2   :  { %1197 = vmatpush.bf16.msrb.mxu1 %v3072_v63  ;;  %v4249_v63 = vld [vmem:[#allocation8 + $0x44] sm:$0xf]  ;;  %v3672_v45 = vor.u32 %v4297_v39, %v3669_v42 }
  0xa3   :  { %1216 = vmatpush.bf16.msrb.mxu2 %v3200_v49  ;;  %v3480_v3 = vor.u32 %v4249_v63, %v3477_v2  ;;  %v4264_v2 = vld [vmem:[#allocation8 + $0xb4] sm:$0xf0] }
  0xa4   :  { %1235 = vmatpush.bf16.msrb.mxu3 %v3328_v0 }
  0xa5   :  { %2049 = vmatpush.bf16.msra.mxu0 %v3556_v60  ;;  %1198 = vmatmul.bf16.vlgmr.msrb.gmra.mxu1 %v4794_v53  ;;  %v4243_v53 = vld [vmem:[#allocation8 + $0xc] sm:$0xf0] }
  0xa6   :  { %1179 = vmatmul.bf16.vlgmr.msrb.gmra.mxu0 %v4792_v48  ;;  %v3460_v48 = vor.u32 %v4247_v15, %v3459_v14  ;;  %v3461_v14 = vld [vmem:[#allocation8 + $0x30] sm:$0xf0] }
  0xa7   :  { %1236 = vmatmul.bf16.vlgmr.msrb.gmra.mxu3 %v4798_v57  ;;  %v3683_v57 = vld [vmem:[#allocation8 + $0x1e0] sm:$0xf] }
  0xa8   :  { %1217 = vmatmul.bf16.vlgmr.msrb.gmra.mxu2 %v4796_v54  ;;  %v3444_v54 = vor.u32 %v4243_v53, %v3443_v16  ;;  %v3684_v19 = vor.u32 %v4303_v17, %v3683_v57  ;;  %v3571_v53 = vld [vmem:[#allocation8 + $0x100] sm:$0xf]  ;;  %v4241_v57 = vld [vmem:[#allocation8 + $0x4] sm:$0xf] }
  0xa9   :  { %2050 = vmatpush.bf16.msra.mxu0 %v3540_v1  ;;  %v3604_v1 = vor.u32 %v4283_v62, %v3603_v61 }
  0xaa   :  { %2068 = vmatpush.bf16.msra.mxu1 %v3684_v19 }
  0xad   :  { %2051 = vmatpush.bf16.msra.mxu0 %v3524_v4 }
  0xae   :  { %2069 = vmatpush.bf16.msra.mxu1 %v3668_v24  ;;  %v3811_v24 = vld [vmem:[#allocation8 + $0x2e0] sm:$0xf] }
  0xb1   :  { %2052 = vmatpush.bf16.msra.mxu0 %v3508_v7  ;;  %v4279_v7 = vld [vmem:[#allocation8 + $0x12c] sm:$0xf0] }
  0xb5   :  { %2053 = vmatpush.bf16.msra.mxu0 %v3492_v10  ;;  %1203 = vmatmul.bf16.gmra.mxu1 %v4806_v50  ;;  %v3541_v50 = vld [vmem:[#allocation8 + $0xd0] sm:$0xf0] }
  0xb6   :  { %1184 = vmatmul.bf16.gmra.mxu0 %v4804_v44  ;;  %v4265_v44 = vld [vmem:[#allocation8 + $0xc4] sm:$0xf] }
  0xb7   :  { %1241 = vmatmul.bf16.gmra.mxu3 %v4810_v56  ;;  %v3651_v56 = vld [vmem:[#allocation8 + $0x1a0] sm:$0xf] }
  0xb8   :  { %1222 = vmatmul.bf16.gmra.mxu2 %v4808_v51  ;;  %v3544_v51 = vor.u32 %v4265_v44, %v3541_v50  ;;  %v3652_v30 = vor.u32 %v4295_v26, %v3651_v56  ;;  %v4335_v50 = vld [vmem:[#allocation8 + $0x2ec] sm:$0xf0] }
  0xb9   :  { %2054 = vmatpush.bf16.msra.mxu0 %v3476_v13  ;;  %v3588_v13 = vor.u32 %v4279_v7, %v3587_v6 }
  0xba   :  { %2070 = vmatpush.bf16.msra.mxu1 %v3652_v30  ;;  %v3685_v30 = vld [vmem:[#allocation8 + $0x1f0] sm:$0xf0] }
  0xbd   :  { %2055 = vmatpush.bf16.msra.mxu0 %v3460_v48  ;;  %v3464_v48 = vor.u32 %v4245_v8, %v3461_v14  ;;  %v4289_v14 = vld [vmem:[#allocation8 + $0x184] sm:$0xf] }
  0xbe   :  { %2071 = vmatpush.bf16.msra.mxu1 %v3636_v37  ;;  %v3795_v37 = vld [vmem:[#allocation8 + $0x2c0] sm:$0xf] }
  0xc1   :  { %2056 = vmatpush.bf16.msra.mxu0 %v3444_v54  ;;  %v4275_v54 = vld [vmem:[#allocation8 + $0x10c] sm:$0xf0] }
  0xc2   :  { %v971_v32 = vpop.f32.mrf.mxu1  ;;  %2072 = vmatpush.bf16.msra.mxu1 %v3620_v52  ;;  %v3572_v20 = vor.u32 %v4275_v54, %v3571_v53  ;;  %v4260_v53 = vld [vmem:[#allocation8 + $0x94] sm:$0xf0] }
  0xc3   :  { %v952_v29 = vpop.f32.mrf.mxu0 }
  0xc4   :  { %v953_v36 = vadd.f32 %v952_v29, %v4843_v28  ;;  %v3812_v29 = vor.u32 %v4335_v50, %v3811_v24  ;;  %v3621_v24 = vld [vmem:[#allocation8 + $0x170] sm:$0xf0]  ;;  %v3499_v50 = vld [vmem:[#allocation8 + $0x68] sm:$0xf] }
  0xc5   :  { %2125 = vmatpush.bf16.msrb.mxu0 %v3560_v21  ;;  %v3445_v21 = vld [vmem:[#allocation8 + $0x10] sm:$0xf0] }
  0xc6   :  { %v972_v46 = vadd.f32 %v971_v32, %v953_v36  ;;  %2073 = vmatpush.bf16.msra.mxu1 %v3604_v1  ;;  %v3448_v22 = vor.u32 %v4241_v57, %v3445_v21  ;;  %v4272_v32 = vld [vmem:[#allocation8 + $0xf4] sm:$0xf0]  ;;  %2087 = vmatpush.bf16.msra.mxu2 %v3812_v29  ;;  %v3531_v1 = vld [vmem:[#allocation8 + $0xa8] sm:$0xf] }
  0xc7   :  { %v3564_v35 = vor.u32 %v4272_v32, %v3563_v31  ;;  %v3532_v6 = vor.u32 %v4264_v2, %v3531_v1  ;;  %v3731_v32 = vld [vmem:[#allocation8 + $0x240] sm:$0xf] }
  0xc9   :  { %2126 = vmatpush.bf16.msrb.mxu0 %v3544_v51  ;;  %v4301_v51 = vld [vmem:[#allocation8 + $0x1e4] sm:$0xf] }
  0xca   :  { %v1009_v47 = vpop.f32.mrf.mxu3  ;;  %v973_v58 = vpop.f32.mrf.mxu1  ;;  %2074 = vmatpush.bf16.msra.mxu1 %v3588_v13  ;;  %v3688_v34 = vor.u32 %v4301_v51, %v3685_v30  ;;  %v4256_v51 = vld [vmem:[#allocation8 + $0x74] sm:$0xf0] }
  0xcb   :  { %v990_v41 = vpop.f32.mrf.mxu2  ;;  %v954_v49 = vpop.f32.mrf.mxu0  ;;  %v3500_v29 = vor.u32 %v4256_v51, %v3499_v50  ;;  %v4270_v51 = vld [vmem:[#allocation8 + $0xec] sm:$0xf] }
  0xcc   :  { %v955_v60 = vadd.f32 %v954_v49, %v4843_v28  ;;  %v991_v0 = vadd.f32 %v990_v41, %v972_v46  ;;  %v3796_v41 = vor.u32 %v4331_v38, %v3795_v37  ;;  %v4268_v46 = vld [vmem:[#allocation8 + $0xd4] sm:$0xf0]  ;;  %v4853_v49 = vperm.slane %v4840_v25, 1  ;;  %v3483_v37 = vld [vmem:[#allocation8 + $0x48] sm:$0xf] }
  0xcd   :  { %2127 = vmatpush.bf16.msrb.mxu0 %v3528_v33  ;;  %v3548_v52 = vor.u32 %v4268_v46, %v3547_v43  ;;  %v4252_v38 = vld [vmem:[#allocation8 + $0x54] sm:$0xf0]  ;;  %v3715_v43 = vld [vmem:[#allocation8 + $0x220] sm:$0xf]  ;;  %v4277_v46 = vld [vmem:[#allocation8 + $0x124] sm:$0xf] }
  0xce   :  { %v974_v4 = vadd.f32 %v973_v58, %v955_v60  ;;  %v1010_v9 = vadd.f32 %v1009_v47, %v991_v0  ;;  %2075 = vmatpush.bf16.msra.mxu1 %v3572_v20  ;;  %2088 = vmatpush.bf16.msra.mxu2 %v3796_v41  ;;  %v4327_v58 = vld [vmem:[#allocation8 + $0x2ac] sm:$0xf0]  ;;  %v3653_v0 = vld [vmem:[#allocation8 + $0x1b0] sm:$0xf0]  ;;  %v4285_v20 = vld [vmem:[#allocation8 + $0x164] sm:$0xf] }
  0xd0   :  { %v1247_v17 = vmax.f32 %v1010_v9, 0.0  ;;  %v3763_v9 = vld [vmem:[#allocation8 + $0x280] sm:$0xf] }
  0xd1   :  { %2128 = vmatpush.bf16.msrb.mxu0 %v3512_v40 }
  0xd2   :  { %v1011_v11 = vpop.f32.mrf.mxu3  ;;  %v976_v15 = vpop.f32.mrf.mxu1  ;;  %2144 = vmatpush.bf16.msrb.mxu1 %v3688_v34  ;;  %v4281_v34 = vld [vmem:[#allocation8 + $0x144] sm:$0xf] }
  0xd3   :  { %v992_v5 = vpop.f32.mrf.mxu2  ;;  %v957_v12 = vpop.f32.mrf.mxu0 }
  0xd4   :  { %v993_v10 = vadd.f32 %v992_v5, %v974_v4  ;;  %v958_v19 = vadd.f32 %v957_v12, %v4843_v28 }
  0xd5   :  { %2129 = vmatpush.bf16.msrb.mxu0 %v3496_v59  ;;  %v4293_v59 = vld [vmem:[#allocation8 + $0x1a4] sm:$0xf] }
  0xd6   :  { %v1012_v16 = vadd.f32 %v1011_v11, %v993_v10  ;;  %v977_v56 = vadd.f32 %v976_v15, %v958_v19  ;;  %2145 = vmatpush.bf16.msrb.mxu1 %v3672_v45  ;;  %v3656_v5 = vor.u32 %v4293_v59, %v3653_v0  ;;  %v4323_v10 = vld [vmem:[#allocation8 + $0x28c] sm:$0xf0]  ;;  %v3637_v15 = vld [vmem:[#allocation8 + $0x190] sm:$0xf0]  ;;  %v4248_v59 = vld [vmem:[#allocation8 + $0x34] sm:$0xf0] }
  0xd7   :  { %v3764_v13 = vor.u32 %v4323_v10, %v3763_v9  ;;  %v4319_v19 = vld [vmem:[#allocation8 + $0x26c] sm:$0xf0]  ;;  %v4244_v9 = vld [vmem:[#allocation8 + $0x14] sm:$0xf0] }
  0xd8   :  { %v1251_v18 = vmax.f32 %v1012_v16, 0.0  ;;  %v3515_v16 = vld [vmem:[#allocation8 + $0x88] sm:$0xf]  ;;  %v4311_v45 = vld [vmem:[#allocation8 + $0x22c] sm:$0xf0] }
  0xd9   :  { %2130 = vmatpush.bf16.msrb.mxu0 %v3480_v3 }
  0xda   :  { %v4848_v23 = vpack.c.bf16 %v1251_v18, %v1247_v17  ;;  %v1014_v26 = vpop.f32.mrf.mxu3  ;;  %v978_v33 = vpop.f32.mrf.mxu1  ;;  %2146 = vmatpush.bf16.msrb.mxu1 %v3656_v5  ;;  %v3516_v17 = vor.u32 %v4260_v53, %v3515_v16  ;;  %v3747_v18 = vld [vmem:[#allocation8 + $0x260] sm:$0xf]  ;;  %v4273_v5 = vld [vmem:[#allocation8 + $0x104] sm:$0xf] }
  0xdb   :  { %v995_v44 = vpop.f32.mrf.mxu2  ;;  %v959_v27 = vpop.f32.mrf.mxu0  ;;  %v4333_v16 = vld [vmem:[#allocation8 + $0x2e4] sm:$0xf] }
  0xdc   :  { %2057 = vmatmul.bf16.vlgmr.msra.gmra.mxu0 %v4848_v23  ;;  %v960_v36 = vadd.f32 %v959_v27, %v4843_v28  ;;  %v996_v40 = vadd.f32 %v995_v44, %v977_v56  ;;  %v3779_v28 = vld [vmem:[#allocation8 + $0x2a0] sm:$0xf]  ;;  %v3748_v44 = vor.u32 %v4319_v19, %v3747_v18  ;;  %v3624_v27 = vor.u32 %v4285_v20, %v3621_v24  ;;  %v3813_v18 = vld [vmem:[#allocation8 + $0x2f0] sm:$0xf0]  ;;  %v3691_v19 = vld [vmem:[#allocation8 + $0x1e8] sm:$0xf] }
  0xdd   :  { %2131 = vmatpush.bf16.msrb.mxu0 %v3464_v48  ;;  %v3780_v63 = vor.u32 %v4327_v58, %v3779_v28  ;;  %v3640_v48 = vor.u32 %v4289_v14, %v3637_v15  ;;  %v3589_v28 = vld [vmem:[#allocation8 + $0x130] sm:$0xf0]  ;;  %v3467_v58 = vld [vmem:[#allocation8 + $0x28] sm:$0xf]  ;;  %v3939_v15 = vld [vmem:[#allocation8 + $0x3e0] sm:$0xf]  ;;  %v3816_v24 = vor.u32 %v4333_v16, %v3813_v18 }
  0xde   :  { %v979_v47 = vadd.f32 %v978_v33, %v960_v36  ;;  %v1015_v60 = vadd.f32 %v1014_v26, %v996_v40  ;;  %v4315_v33 = vld [vmem:[#allocation8 + $0x24c] sm:$0xf0]  ;;  %v3605_v36 = vld [vmem:[#allocation8 + $0x150] sm:$0xf0]  ;;  %v3484_v40 = vor.u32 %v4252_v38, %v3483_v37  ;;  %v3468_v0 = vor.u32 %v4248_v59, %v3467_v58  ;;  %v4304_v20 = vld [vmem:[#allocation8 + $0x1f4] sm:$0xf0] }
  0xdf   :  { %2089 = vmatpush.bf16.msra.mxu2 %v3780_v63  ;;  %2147 = vmatpush.bf16.msrb.mxu1 %v3640_v48  ;;  %v3608_v39 = vor.u32 %v4281_v34, %v3605_v36  ;;  %v3592_v63 = vor.u32 %v4277_v46, %v3589_v28  ;;  %v4367_v48 = vld [vmem:[#allocation8 + $0x3ec] sm:$0xf0]  ;;  %v3692_v50 = vor.u32 %v4304_v20, %v3691_v19  ;;  %v3675_v34 = vld [vmem:[#allocation8 + $0x1c8] sm:$0xf]  ;;  %v4325_v46 = vld [vmem:[#allocation8 + $0x2a4] sm:$0xf] }
  0xe0   :  { %v1255_v11 = vmax.f32 %v1015_v60, 0.0  ;;  %v3781_v28 = vld [vmem:[#allocation8 + $0x2b0] sm:$0xf0]  ;;  %v3659_v58 = vld [vmem:[#allocation8 + $0x1a8] sm:$0xf] }
  0xe1   :  { %2132 = vmatpush.bf16.msrb.mxu0 %v3448_v22  ;;  %v4296_v59 = vld [vmem:[#allocation8 + $0x1b4] sm:$0xf0]  ;;  %v3517_v18 = vld [vmem:[#allocation8 + $0x98] sm:$0xf0] }
  0xe2   :  { %v1016_v62 = vpop.f32.mrf.mxu3  ;;  %v1047_v4 = vpop.f32.mrf.mxu1  ;;  %v4292_v16 = vld [vmem:[#allocation8 + $0x194] sm:$0xf0] }
  0xe3   :  { %v997_v55 = vpop.f32.mrf.mxu2  ;;  %v1028_v3 = vpop.f32.mrf.mxu0  ;;  %2090 = vmatpush.bf16.msra.mxu2 %v3764_v13  ;;  %2148 = vmatpush.bf16.msrb.mxu1 %v3624_v27 }
  0xe4   :  { %v998_v61 = vadd.f32 %v997_v55, %v979_v47  ;;  %v1029_v8 = vadd.f32 %v1028_v3, %v4853_v49  ;;  %v3716_v55 = vor.u32 %v4311_v45, %v3715_v43  ;;  %v3699_v3 = vld [vmem:[#allocation8 + $0x200] sm:$0xf]  ;;  %v4359_v45 = vld [vmem:[#allocation8 + $0x3ac] sm:$0xf0] }
  0xe5   :  { %2201 = vmatpush.bf16.msra.mxu0 %v3564_v35  ;;  %v3732_v35 = vor.u32 %v4315_v33, %v3731_v32  ;;  %v3797_v33 = vld [vmem:[#allocation8 + $0x2d0] sm:$0xf0]  ;;  %v3907_v43 = vld [vmem:[#allocation8 + $0x3a0] sm:$0xf] }
  0xe6   :  { %v1017_v7 = vadd.f32 %v1016_v62, %v998_v61  ;;  %v1048_v57 = vadd.f32 %v1047_v4, %v1029_v8  ;;  %v4307_v4 = vld [vmem:[#allocation8 + $0x20c] sm:$0xf0]  ;;  %v3451_v8 = vld [vmem:[#allocation8 + $0x8] sm:$0xf] }
  0xe7   :  { %2091 = vmatpush.bf16.msra.mxu2 %v3748_v44  ;;  %2149 = vmatpush.bf16.msrb.mxu1 %v3608_v39  ;;  %v3452_v13 = vor.u32 %v4244_v9, %v3451_v8  ;;  %v4266_v39 = vld [vmem:[#allocation8 + $0xcc] sm:$0xf]  ;;  %v4355_v8 = vld [vmem:[#allocation8 + $0x38c] sm:$0xf0] }
  0xe8   :  { %v1259_v12 = vmax.f32 %v1017_v7, 0.0  ;;  %v3573_v7 = vld [vmem:[#allocation8 + $0x110] sm:$0xf0] }
  0xe9   :  { %2202 = vmatpush.bf16.msra.mxu0 %v3548_v52 }
  0xea   :  { %v4856_v54 = vpack.c.bf16 %v1259_v12, %v1255_v11  ;;  %v1085_v22 = vpop.f32.mrf.mxu3  ;;  %v1049_v26 = vpop.f32.mrf.mxu1  ;;  %v3576_v12 = vor.u32 %v4273_v5, %v3573_v7  ;;  %v3891_v7 = vld [vmem:[#allocation8 + $0x380] sm:$0xf] }
  0xeb   :  { %v1066_v21 = vpop.f32.mrf.mxu2  ;;  %v1030_v56 = vpop.f32.mrf.mxu0  ;;  %2092 = vmatpush.bf16.msra.mxu2 %v3732_v35  ;;  %2150 = vmatpush.bf16.msrb.mxu1 %v3592_v63  ;;  %v4300_v35 = vld [vmem:[#allocation8 + $0x1d4] sm:$0xf0]  ;;  %v3892_v9 = vor.u32 %v4355_v8, %v3891_v7 }
  0xec   :  { %2062 = vmatmul.bf16.gmra.mxu0 %v4856_v54  ;;  %v1067_v30 = vadd.f32 %v1066_v21, %v1048_v57  ;;  %v1031_v31 = vadd.f32 %v1030_v56, %v4853_v49  ;;  %v3565_v56 = vld [vmem:[#allocation8 + $0xf8] sm:$0xf0]  ;;  %v3676_v38 = vor.u32 %v4300_v35, %v3675_v34 }
  0xed   :  { %2203 = vmatpush.bf16.msra.mxu0 %v3532_v6  ;;  %v3700_v6 = vor.u32 %v4307_v4, %v3699_v3  ;;  %v3533_v3 = vld [vmem:[#allocation8 + $0xb8] sm:$0xf0] }
  0xee   :  { %v1086_v41 = vadd.f32 %v1085_v22, %v1067_v30  ;;  %v1050_v42 = vadd.f32 %v1049_v26, %v1031_v31  ;;  %v3568_v26 = vor.u32 %v4270_v51, %v3565_v56  ;;  %v4363_v30 = vld [vmem:[#allocation8 + $0x3cc] sm:$0xf0]  ;;  %v4329_v31 = vld [vmem:[#allocation8 + $0x2c4] sm:$0xf]  ;;  %v3749_v56 = vld [vmem:[#allocation8 + $0x270] sm:$0xf0] }
  0xef   :  { %2093 = vmatpush.bf16.msra.mxu2 %v3716_v55  ;;  %2151 = vmatpush.bf16.msrb.mxu1 %v3576_v12  ;;  %v3800_v37 = vor.u32 %v4329_v31, %v3797_v33  ;;  %v3908_v55 = vor.u32 %v4359_v45, %v3907_v43  ;;  %v3643_v12 = vld [vmem:[#allocation8 + $0x188] sm:$0xf]  ;;  %v4254_v33 = vld [vmem:[#allocation8 + $0x6c] sm:$0xf]  ;;  %v3501_v34 = vld [vmem:[#allocation8 + $0x78] sm:$0xf0] }
  0xf0   :  { %v1248_v1 = vmax.f32 %v1086_v41, 0.0  ;;  %v4867_v41 = vperm.slane %v4840_v25, 2  ;;  %v3611_v43 = vld [vmem:[#allocation8 + $0x148] sm:$0xf]  ;;  %v4284_v45 = vld [vmem:[#allocation8 + $0x154] sm:$0xf0] }
  0xf1   :  { %2204 = vmatpush.bf16.msra.mxu0 %v3516_v17  ;;  %v3940_v17 = vor.u32 %v4367_v48, %v3939_v15 }
  0xf2   :  { %v1087_v52 = vpop.f32.mrf.mxu3  ;;  %v1052_v62 = vpop.f32.mrf.mxu1 }
  0xf3   :  { %v1068_v47 = vpop.f32.mrf.mxu2  ;;  %v1033_v61 = vpop.f32.mrf.mxu0  ;;  %2094 = vmatpush.bf16.msra.mxu2 %v3700_v6  ;;  %2106 = vmatpush.bf16.msra.mxu3 %v3940_v17  ;;  %v3644_v17 = vor.u32 %v4292_v16, %v3643_v12  ;;  %v4339_v16 = vld [vmem:[#allocation8 + $0x30c] sm:$0xf0] }
  0xf4   :  { %v1069_v60 = vadd.f32 %v1068_v47, %v1050_v42  ;;  %v1034_v11 = vadd.f32 %v1033_v61, %v4853_v49 }
  0xf5   :  { %2205 = vmatpush.bf16.msra.mxu0 %v3500_v29  ;;  %v3923_v29 = vld [vmem:[#allocation8 + $0x3c0] sm:$0xf] }
  0xf6   :  { %v1088_v2 = vadd.f32 %v1087_v52, %v1069_v60  ;;  %v1053_v21 = vadd.f32 %v1052_v62, %v1034_v11  ;;  %v3924_v32 = vor.u32 %v4363_v30, %v3923_v29  ;;  %v3765_v11 = vld [vmem:[#allocation8 + $0x290] sm:$0xf0] }
  0xf7   :  { %2163 = vmatpush.bf16.msrb.mxu2 %v3816_v24 }
  0xf8   :  { %v1252_v10 = vmax.f32 %v1088_v2, 0.0  ;;  %2107 = vmatpush.bf16.msra.mxu3 %v3924_v32  ;;  %v4262_v2 = vld [vmem:[#allocation8 + $0xac] sm:$0xf] }
  0xf9   :  { %2206 = vmatpush.bf16.msra.mxu0 %v3484_v40  ;;  %v3549_v40 = vld [vmem:[#allocation8 + $0xd8] sm:$0xf0]  ;;  %v3536_v5 = vor.u32 %v4262_v2, %v3533_v3  ;;  %v3717_v2 = vld [vmem:[#allocation8 + $0x230] sm:$0xf0]  ;;  %v3595_v3 = vld [vmem:[#allocation8 + $0x128] sm:$0xf] }
  0xfa   :  { %v4861_v14 = vpack.c.bf16 %v1252_v10, %v1248_v1  ;;  %v1090_v57 = vpop.f32.mrf.mxu3  ;;  %v1054_v44 = vpop.f32.mrf.mxu1  ;;  %v3660_v1 = vor.u32 %v4296_v59, %v3659_v58  ;;  %v4321_v10 = vld [vmem:[#allocation8 + $0x284] sm:$0xf] }
  0xfb   :  { %v1071_v53 = vpop.f32.mrf.mxu2  ;;  %v1035_v22 = vpop.f32.mrf.mxu0  ;;  %2164 = vmatpush.bf16.msrb.mxu2 %v3800_v37  ;;  %v3768_v48 = vor.u32 %v4321_v10, %v3765_v11  ;;  %v4246_v10 = vld [vmem:[#allocation8 + $0x2c] sm:$0xf]  ;;  %v3469_v11 = vld [vmem:[#allocation8 + $0x38] sm:$0xf0] }
  0xfc   :  { %2133 = vmatmul.bf16.vlgmr.msrb.gmra.mxu0 %v4848_v23  ;;  %2076 = vmatmul.bf16.vlgmr.msra.gmra.mxu1 %v4861_v14  ;;  %v1036_v27 = vadd.f32 %v1035_v22, %v4853_v49  ;;  %v1072_v36 = vadd.f32 %v1071_v53, %v1053_v21  ;;  %v3552_v49 = vor.u32 %v4266_v39, %v3549_v40  ;;  %v4258_v53 = vld [vmem:[#allocation8 + $0x8c] sm:$0xf]  ;;  %v3875_v21 = vld [vmem:[#allocation8 + $0x360] sm:$0xf]  ;;  %v4351_v22 = vld [vmem:[#allocation8 + $0x36c] sm:$0xf0] }
  0xfd   :  { %2207 = vmatpush.bf16.msra.mxu0 %v3468_v0  ;;  %2220 = vmatpush.bf16.msra.mxu1 %v3692_v50  ;;  %v3784_v0 = vor.u32 %v4325_v46, %v3781_v28  ;;  %v3520_v20 = vor.u32 %v4258_v53, %v3517_v18  ;;  %v3876_v51 = vor.u32 %v4351_v22, %v3875_v21  ;;  %v4347_v39 = vld [vmem:[#allocation8 + $0x34c] sm:$0xf0]  ;;  %v4313_v40 = vld [vmem:[#allocation8 + $0x244] sm:$0xf]  ;;  %v3579_v18 = vld [vmem:[#allocation8 + $0x108] sm:$0xf] }
  0xfe   :  { %v1055_v42 = vadd.f32 %v1054_v44, %v1036_v27  ;;  %v1091_v60 = vadd.f32 %v1090_v57, %v1072_v36  ;;  %2108 = vmatpush.bf16.msra.mxu3 %v3908_v55  ;;  %v4317_v44 = vld [vmem:[#allocation8 + $0x264] sm:$0xf]  ;;  %v4288_v27 = vld [vmem:[#allocation8 + $0x174] sm:$0xf0]  ;;  %v3504_v36 = vor.u32 %v4254_v33, %v3501_v34  ;;  %v3485_v55 = vld [vmem:[#allocation8 + $0x58] sm:$0xf0] }
  0xff   :  { %2165 = vmatpush.bf16.msrb.mxu2 %v3784_v0  ;;  %v3752_v31 = vor.u32 %v4317_v44, %v3749_v56  ;;  %v4305_v53 = vld [vmem:[#allocation8 + $0x204] sm:$0xf]  ;;  %v3819_v33 = vld [vmem:[#allocation8 + $0x2e8] sm:$0xf]  ;;  %v4336_v34 = vld [vmem:[#allocation8 + $0x2f4] sm:$0xf0] }
 0x101   :  { %2208 = vmatpush.bf16.msra.mxu0 %v3452_v13  ;;  %2221 = vmatpush.bf16.msra.mxu1 %v3676_v38  ;;  %v1256_v13 = vmax.f32 %v1091_v60, 0.0  ;;  %v3859_v38 = vld [vmem:[#allocation8 + $0x340] sm:$0xf] }
 0x102   :  { %v1092_v52 = vpop.f32.mrf.mxu3  ;;  %v1123_v63 = vpop.f32.mrf.mxu1  ;;  %2109 = vmatpush.bf16.msra.mxu3 %v3892_v9  ;;  %v3843_v60 = vld [vmem:[#allocation8 + $0x320] sm:$0xf] }
 0x103   :  { %v1073_v47 = vpop.f32.mrf.mxu2  ;;  %v1104_v62 = vpop.f32.mrf.mxu0  ;;  %2166 = vmatpush.bf16.msrb.mxu2 %v3768_v48  ;;  %v3827_v48 = vld [vmem:[#allocation8 + $0x300] sm:$0xf] }
 0x104   :  { %v1074_v61 = vadd.f32 %v1073_v47, %v1055_v42  ;;  %v1105_v4 = vadd.f32 %v1104_v62, %v4867_v41  ;;  %v3733_v42 = vld [vmem:[#allocation8 + $0x250] sm:$0xf0]  ;;  %v3612_v47 = vor.u32 %v4284_v45, %v3611_v43  ;;  %v4309_v62 = vld [vmem:[#allocation8 + $0x224] sm:$0xf] }
 0x105   :  { %2277 = vmatpush.bf16.msrb.mxu0 %v3568_v26  ;;  %2222 = vmatpush.bf16.msra.mxu1 %v3660_v1  ;;  %v3627_v26 = vld [vmem:[#allocation8 + $0x168] sm:$0xf]  ;;  %v3736_v46 = vor.u32 %v4313_v40, %v3733_v42  ;;  %v3720_v8 = vor.u32 %v4309_v62, %v3717_v2  ;;  %v3693_v40 = vld [vmem:[#allocation8 + $0x1f8] sm:$0xf0]  ;;  %v4361_v43 = vld [vmem:[#allocation8 + $0x3c4] sm:$0xf] }
 0x106   :  { %v1093_v6 = vadd.f32 %v1092_v52, %v1074_v61  ;;  %v1124_v57 = vadd.f32 %v1123_v63, %v1105_v4  ;;  %v3628_v32 = vor.u32 %v4288_v27, %v3627_v26  ;;  %2110 = vmatpush.bf16.msra.mxu3 %v3876_v51  ;;  %v4250_v52 = vld [vmem:[#allocation8 + $0x4c] sm:$0xf]  ;;  %v4343_v61 = vld [vmem:[#allocation8 + $0x32c] sm:$0xf0]  ;;  %v4280_v4 = vld [vmem:[#allocation8 + $0x134] sm:$0xf0] }
 0x107   :  { %2167 = vmatpush.bf16.msrb.mxu2 %v3752_v31  ;;  %v3488_v58 = vor.u32 %v4250_v52, %v3485_v55  ;;  %v3844_v1 = vor.u32 %v4343_v61, %v3843_v60  ;;  %v3596_v9 = vor.u32 %v4280_v4, %v3595_v3  ;;  %v3453_v51 = vld [vmem:[#allocation8 + $0x18] sm:$0xf0]  ;;  %v4365_v27 = vld [vmem:[#allocation8 + $0x3e4] sm:$0xf]  ;;  %v3925_v45 = vld [vmem:[#allocation8 + $0x3d0] sm:$0xf0] }
 0x108   :  { %v1260_v15 = vmax.f32 %v1093_v6, 0.0  ;;  %v3928_v52 = vor.u32 %v4361_v43, %v3925_v45  ;;  %v4332_v55 = vld [vmem:[#allocation8 + $0x2d4] sm:$0xf0]  ;;  %v4883_v61 = vperm.slane %v4840_v25, 3  ;;  %v3787_v2 = vld [vmem:[#allocation8 + $0x2a8] sm:$0xf] }
 0x109   :  { %2278 = vmatpush.bf16.msrb.mxu0 %v3552_v49  ;;  %2223 = vmatpush.bf16.msra.mxu1 %v3644_v17  ;;  %v3860_v49 = vor.u32 %v4347_v39, %v3859_v38  ;;  %v3701_v17 = vld [vmem:[#allocation8 + $0x210] sm:$0xf0]  ;;  %v3820_v39 = vor.u32 %v4336_v34, %v3819_v33  ;;  %v4320_v33 = vld [vmem:[#allocation8 + $0x274] sm:$0xf0]  ;;  %v4286_v34 = vld [vmem:[#allocation8 + $0x16c] sm:$0xf] }
 0x10a   :  { %v4870_v19 = vpack.c.bf16 %v1260_v15, %v1256_v13  ;;  %v1161_v50 = vpop.f32.mrf.mxu3  ;;  %v1125_v30 = vpop.f32.mrf.mxu1  ;;  %v3472_v13 = vor.u32 %v4246_v10, %v3469_v11  ;;  %v3704_v44 = vor.u32 %v4305_v53, %v3701_v17  ;;  %v3661_v10 = vld [vmem:[#allocation8 + $0x1b8] sm:$0xf0]  ;;  %v4316_v45 = vld [vmem:[#allocation8 + $0x254] sm:$0xf0] }
 0x10b   :  { %v1142_v24 = vpop.f32.mrf.mxu2  ;;  %v1106_v29 = vpop.f32.mrf.mxu0  ;;  %2111 = vmatpush.bf16.msra.mxu3 %v3860_v49  ;;  %2168 = vmatpush.bf16.msrb.mxu2 %v3736_v46  ;;  %v3803_v46 = vld [vmem:[#allocation8 + $0x2c8] sm:$0xf] }
 0x10c   :  { %2138 = vmatmul.bf16.gmra.mxu0 %v4856_v54  ;;  %2081 = vmatmul.bf16.gmra.mxu1 %v4870_v19  ;;  %v1143_v35 = vadd.f32 %v1142_v24, %v1124_v57  ;;  %v1107_v37 = vadd.f32 %v1106_v29, %v4867_v41  ;;  %v3828_v57 = vor.u32 %v4339_v16, %v3827_v48  ;;  %v3941_v29 = vld [vmem:[#allocation8 + $0x3f0] sm:$0xf0]  ;;  %v3771_v48 = vld [vmem:[#allocation8 + $0x288] sm:$0xf] }
 0x10d   :  { %2279 = vmatpush.bf16.msrb.mxu0 %v3536_v5  ;;  %2224 = vmatpush.bf16.msra.mxu1 %v3628_v32  ;;  %v3944_v32 = vor.u32 %v4365_v27, %v3941_v29  ;;  %v3877_v27 = vld [vmem:[#allocation8 + $0x370] sm:$0xf0]  ;;  %v3755_v29 = vld [vmem:[#allocation8 + $0x268] sm:$0xf] }
 0x10e   :  { %v1162_v28 = vadd.f32 %v1161_v50, %v1143_v35  ;;  %v1126_v59 = vadd.f32 %v1125_v30, %v1107_v37  ;;  %v4242_v50 = vld [vmem:[#allocation8 + $0xc] sm:$0xf] }
 0x10f   :  { %2112 = vmatpush.bf16.msra.mxu3 %v3844_v1  ;;  %2169 = vmatpush.bf16.msrb.mxu2 %v3720_v8  ;;  %v3456_v56 = vor.u32 %v4242_v50, %v3453_v51  ;;  %v4302_v35 = vld [vmem:[#allocation8 + $0x1ec] sm:$0xf]  ;;  %v3909_v1 = vld [vmem:[#allocation8 + $0x3b0] sm:$0xf0]  ;;  %v4328_v8 = vld [vmem:[#allocation8 + $0x2b4] sm:$0xf0] }
 0x110   :  { %v1249_v12 = vmax.f32 %v1162_v28, 0.0  ;;  %v3696_v49 = vor.u32 %v4302_v35, %v3693_v40  ;;  %v4298_v28 = vld [vmem:[#allocation8 + $0x1cc] sm:$0xf]  ;;  %v3788_v11 = vor.u32 %v4328_v8, %v3787_v2  ;;  %v3629_v35 = vld [vmem:[#allocation8 + $0x178] sm:$0xf0] }
 0x111   :  { %2280 = vmatpush.bf16.msrb.mxu0 %v3520_v20  ;;  %2225 = vmatpush.bf16.msra.mxu1 %v3612_v47  ;;  %v4276_v20 = vld [vmem:[#allocation8 + $0x114] sm:$0xf0]  ;;  %v3861_v40 = vld [vmem:[#allocation8 + $0x350] sm:$0xf0] }
 0x112   :  { %v1163_v0 = vpop.f32.mrf.mxu3  ;;  %v1128_v7 = vpop.f32.mrf.mxu1  ;;  %v3580_v24 = vor.u32 %v4276_v20, %v3579_v18  ;;  %v4324_v18 = vld [vmem:[#allocation8 + $0x294] sm:$0xf0]  ;;  %v4290_v20 = vld [vmem:[#allocation8 + $0x18c] sm:$0xf] }
 0x113   :  { %v1144_v63 = vpop.f32.mrf.mxu2  ;;  %v1109_v6 = vpop.f32.mrf.mxu0  ;;  %2113 = vmatpush.bf16.msra.mxu3 %v3828_v57  ;;  %2170 = vmatpush.bf16.msrb.mxu2 %v3704_v44 }
 0x114   :  { %v1145_v5 = vadd.f32 %v1144_v63, %v1126_v59  ;;  %v1110_v22 = vadd.f32 %v1109_v6, %v4867_v41  ;;  %v3677_v59 = vld [vmem:[#allocation8 + $0x1d8] sm:$0xf0] }
 0x115   :  { %2281 = vmatpush.bf16.msrb.mxu0 %v3504_v36  ;;  %2226 = vmatpush.bf16.msra.mxu1 %v3596_v9  ;;  %v3680_v62 = vor.u32 %v4298_v28, %v3677_v59  ;;  %v4294_v9 = vld [vmem:[#allocation8 + $0x1ac] sm:$0xf]  ;;  %v3845_v28 = vld [vmem:[#allocation8 + $0x330] sm:$0xf0]  ;;  %v3723_v59 = vld [vmem:[#allocation8 + $0x228] sm:$0xf] }
 0x116   :  { %v1164_v15 = vadd.f32 %v1163_v0, %v1145_v5  ;;  %v1129_v36 = vadd.f32 %v1128_v7, %v1110_v22  ;;  %v3664_v25 = vor.u32 %v4294_v9, %v3661_v10  ;;  %v3645_v22 = vld [vmem:[#allocation8 + $0x198] sm:$0xf0] }
 0x117   :  { %2182 = vmatpush.bf16.msrb.mxu3 %v3944_v32 }
 0x118   :  { %v1253_v21 = vmax.f32 %v1164_v15, 0.0  ;;  %v3893_v15 = vld [vmem:[#allocation8 + $0x390] sm:$0xf0] }
 0x119   :  { %2282 = vmatpush.bf16.msrb.mxu0 %v3488_v58  ;;  %2227 = vmatpush.bf16.msra.mxu1 %v3580_v24  ;;  %v3804_v58 = vor.u32 %v4332_v55, %v3803_v46  ;;  %v3648_v24 = vor.u32 %v4290_v20, %v3645_v22  ;;  %v4282_v46 = vld [vmem:[#allocation8 + $0x14c] sm:$0xf]  ;;  %v4341_v55 = vld [vmem:[#allocation8 + $0x324] sm:$0xf] }
 0x11a   :  { %v4876_v26 = vpack.c.bf16 %v1253_v21, %v1249_v12  ;;  %v1166_v31 = vpop.f32.mrf.mxu3  ;;  %v1130_v38 = vpop.f32.mrf.mxu1  ;;  %v3772_v21 = vor.u32 %v4324_v18, %v3771_v48  ;;  %v4274_v48 = vld [vmem:[#allocation8 + $0x10c] sm:$0xf]  ;;  %v3581_v18 = vld [vmem:[#allocation8 + $0x118] sm:$0xf0] }
 0x11b   :  { %v1147_v30 = vpop.f32.mrf.mxu2  ;;  %v1111_v37 = vpop.f32.mrf.mxu0  ;;  %2183 = vmatpush.bf16.msrb.mxu3 %v3928_v52 }
 0x11c   :  { %2209 = vmatmul.bf16.vlgmr.msra.gmra.mxu0 %v4848_v23  ;;  %2095 = vmatmul.bf16.vlgmr.msra.gmra.mxu2 %v4876_v26  ;;  %v1112_v42 = vadd.f32 %v1111_v37, %v4867_v41  ;;  %v1148_v47 = vadd.f32 %v1147_v30, %v1129_v36  ;;  %v4357_v41 = vld [vmem:[#allocation8 + $0x3a4] sm:$0xf]  ;;  %v3756_v37 = vor.u32 %v4320_v33, %v3755_v29  ;;  %v3931_v33 = vld [vmem:[#allocation8 + $0x3c8] sm:$0xf] }
 0x11d   :  { %2283 = vmatpush.bf16.msrb.mxu0 %v3472_v13  ;;  %2152 = vmatmul.bf16.vlgmr.msrb.gmra.mxu1 %v4861_v14  ;;  %v3912_v7 = vor.u32 %v4357_v41, %v3909_v1  ;;  %v4353_v13 = vld [vmem:[#allocation8 + $0x384] sm:$0xf]  ;;  %v4278_v41 = vld [vmem:[#allocation8 + $0x12c] sm:$0xf]  ;;  %v3597_v1 = vld [vmem:[#allocation8 + $0x138] sm:$0xf0] }
 0x11e   :  { %2239 = vmatpush.bf16.msra.mxu2 %v3820_v39  ;;  %2296 = vmatpush.bf16.msrb.mxu1 %v3696_v49  ;;  %v1131_v60 = vadd.f32 %v1130_v38, %v1112_v42  ;;  %v1167_v3 = vadd.f32 %v1166_v31, %v1148_v47  ;;  %v3896_v17 = vor.u32 %v4353_v13, %v3893_v15  ;;  %v4345_v39 = vld [vmem:[#allocation8 + $0x344] sm:$0xf]  ;;  %v3739_v49 = vld [vmem:[#allocation8 + $0x248] sm:$0xf]  ;;  %v3613_v47 = vld [vmem:[#allocation8 + $0x158] sm:$0xf0] }
 0x11f   :  { %2184 = vmatpush.bf16.msrb.mxu3 %v3912_v7  ;;  %v3632_v38 = vor.u32 %v4286_v34, %v3629_v35  ;;  %v3864_v43 = vor.u32 %v4345_v39, %v3861_v40  ;;  %v3740_v52 = vor.u32 %v4316_v45, %v3739_v49  ;;  %v3600_v10 = vor.u32 %v4278_v41, %v3597_v1  ;;  %v3707_v13 = vld [vmem:[#allocation8 + $0x208] sm:$0xf]  ;;  %v4308_v15 = vld [vmem:[#allocation8 + $0x214] sm:$0xf0]  ;;  %v3773_v41 = vld [vmem:[#allocation8 + $0x298] sm:$0xf0] }
 0x120   :  { %v1257_v16 = vmax.f32 %v1167_v3, 0.0  ;;  %v4364_v34 = vld [vmem:[#allocation8 + $0x3d4] sm:$0xf0]  ;;  %v3915_v49 = vld [vmem:[#allocation8 + $0x3a8] sm:$0xf] }
 0x121   :  { %2284 = vmatpush.bf16.msrb.mxu0 %v3456_v56  ;;  %v4349_v56 = vld [vmem:[#allocation8 + $0x364] sm:$0xf] }
 0x122   :  { %v1168_v0 = vpop.f32.mrf.mxu3  ;;  %2240 = vmatpush.bf16.msra.mxu2 %v3804_v58  ;;  %v1199_v6 = vpop.f32.mrf.mxu1  ;;  %2297 = vmatpush.bf16.msrb.mxu1 %v3680_v62  ;;  %v3880_v32 = vor.u32 %v4349_v56, %v3877_v27  ;;  %v3616_v62 = vor.u32 %v4282_v46, %v3613_v47  ;;  %v4334_v56 = vld [vmem:[#allocation8 + $0x2ec] sm:$0xf]  ;;  %v3789_v47 = vld [vmem:[#allocation8 + $0x2b8] sm:$0xf0] }
 0x123   :  { %v1149_v63 = vpop.f32.mrf.mxu2  ;;  %v1180_v5 = vpop.f32.mrf.mxu0  ;;  %2185 = vmatpush.bf16.msrb.mxu3 %v3896_v17  ;;  %v3708_v17 = vor.u32 %v4308_v15, %v3707_v13  ;;  %v4314_v13 = vld [vmem:[#allocation8 + $0x24c] sm:$0xf] }
 0x124   :  { %v1150_v4 = vadd.f32 %v1149_v63, %v1131_v60  ;;  %v1181_v57 = vadd.f32 %v1180_v5, %v4883_v61  ;;  %v4312_v60 = vld [vmem:[#allocation8 + $0x234] sm:$0xf0]  ;;  %v4337_v5 = vld [vmem:[#allocation8 + $0x304] sm:$0xf] }
 0x126   :  { %v1169_v12 = vadd.f32 %v1168_v0, %v1150_v4  ;;  %2241 = vmatpush.bf16.msra.mxu2 %v3788_v11  ;;  %2298 = vmatpush.bf16.msrb.mxu1 %v3664_v25  ;;  %v1200_v30 = vadd.f32 %v1199_v6, %v1181_v57  ;;  %v3848_v0 = vor.u32 %v4341_v55, %v3845_v28  ;;  %v3829_v6 = vld [vmem:[#allocation8 + $0x310] sm:$0xf0]  ;;  %v4356_v28 = vld [vmem:[#allocation8 + $0x394] sm:$0xf0] }
 0x127   :  { %2186 = vmatpush.bf16.msrb.mxu3 %v3880_v32  ;;  %v3724_v4 = vor.u32 %v4312_v60, %v3723_v59  ;;  %v3832_v25 = vor.u32 %v4337_v5, %v3829_v6  ;;  %v3883_v5 = vld [vmem:[#allocation8 + $0x368] sm:$0xf]  ;;  %v4352_v6 = vld [vmem:[#allocation8 + $0x374] sm:$0xf0] }
 0x128   :  { %v1261_v53 = vmax.f32 %v1169_v12, 0.0 }
 0x12a   :  { %v4886_v44 = vpack.c.bf16 %v1261_v53, %v1257_v16  ;;  %v1237_v51 = vpop.f32.mrf.mxu3  ;;  %2242 = vmatpush.bf16.msra.mxu2 %v3772_v21  ;;  %v1201_v36 = vpop.f32.mrf.mxu1  ;;  %2299 = vmatpush.bf16.msrb.mxu1 %v3648_v24  ;;  %v3584_v21 = vor.u32 %v4274_v48, %v3581_v18  ;;  %v3851_v48 = vld [vmem:[#allocation8 + $0x328] sm:$0xf] }
 0x12b   :  { %v1218_v50 = vpop.f32.mrf.mxu2  ;;  %v1182_v31 = vpop.f32.mrf.mxu0  ;;  %2187 = vmatpush.bf16.msrb.mxu3 %v3864_v43  ;;  %v4326_v43 = vld [vmem:[#allocation8 + $0x2ac] sm:$0xf] }
 0x12c   :  { %2214 = vmatmul.bf16.gmra.mxu0 %v4856_v54  ;;  %2100 = vmatmul.bf16.gmra.mxu2 %v4886_v44  ;;  %v1183_v42 = vadd.f32 %v1182_v31, %v4883_v61  ;;  %v1219_v58 = vadd.f32 %v1218_v50, %v1200_v30  ;;  %v3947_v50 = vld [vmem:[#allocation8 + $0x3e8] sm:$0xf]  ;;  %v3821_v31 = vld [vmem:[#allocation8 + $0x2f8] sm:$0xf0]  ;;  %v3792_v55 = vor.u32 %v4326_v43, %v3789_v47 }
 0x12d   :  { %2157 = vmatmul.bf16.gmra.mxu1 %v4870_v19  ;;  %v3824_v32 = vor.u32 %v4334_v56, %v3821_v31  ;;  %v4362_v31 = vld [vmem:[#allocation8 + $0x3cc] sm:$0xf] }
 0x12e   :  { %2243 = vmatpush.bf16.msra.mxu2 %v3756_v37  ;;  %2300 = vmatpush.bf16.msrb.mxu1 %v3632_v38  ;;  %v1202_v63 = vadd.f32 %v1201_v36, %v1183_v42  ;;  %v1238_v7 = vadd.f32 %v1237_v51, %v1219_v58  ;;  %v4368_v51 = vld [vmem:[#allocation8 + $0x3f4] sm:$0xf0]  ;;  %v4330_v36 = vld [vmem:[#allocation8 + $0x2cc] sm:$0xf]  ;;  %v3805_v37 = vld [vmem:[#allocation8 + $0x2d8] sm:$0xf0] }
 0x12f   :  { %2188 = vmatpush.bf16.msrb.mxu3 %v3848_v0  ;;  %v3948_v30 = vor.u32 %v4368_v51, %v3947_v50  ;;  %v3808_v39 = vor.u32 %v4330_v36, %v3805_v37  ;;  %v4360_v42 = vld [vmem:[#allocation8 + $0x3b4] sm:$0xf0]  ;;  %v4322_v0 = vld [vmem:[#allocation8 + $0x28c] sm:$0xf]  ;;  %v3709_v51 = vld [vmem:[#allocation8 + $0x218] sm:$0xf0] }
 0x130   :  { %v1250_v16 = vmax.f32 %v1238_v7, 0.0  ;;  %v3916_v46 = vor.u32 %v4360_v42, %v3915_v49  ;;  %v4318_v7 = vld [vmem:[#allocation8 + $0x26c] sm:$0xf]  ;;  %v3901_v37 = vld [vmem:[#allocation8 + $0x398] sm:$0xf0] }
 0x131   :  { %v4306_v50 = vld [vmem:[#allocation8 + $0x20c] sm:$0xf] }
 0x132   :  { %v1239_v3 = vpop.f32.mrf.mxu3  ;;  %2244 = vmatpush.bf16.msra.mxu2 %v3740_v52  ;;  %2301 = vmatpush.bf16.msrb.mxu1 %v3616_v62  ;;  %v1204_v12 = vpop.f32.mrf.mxu1  ;;  %v3712_v56 = vor.u32 %v4306_v50, %v3709_v51  ;;  %v4354_v36 = vld [vmem:[#allocation8 + $0x38c] sm:$0xf]  ;;  %v4940_v50 = vld [vmem:[#allocation10] sm:$0xf] }
 0x133   :  { %v1220_v2 = vpop.f32.mrf.mxu2  ;;  %v1185_v9 = vpop.f32.mrf.mxu0  ;;  %2189 = vmatpush.bf16.msrb.mxu3 %v3832_v25  ;;  %v4348_v25 = vld [vmem:[#allocation8 + $0x354] sm:$0xf0]  ;;  %v4346_v42 = vld [vmem:[#allocation8 + $0x34c] sm:$0xf] }
 0x134   :  { %v1221_v8 = vadd.f32 %v1220_v2, %v1202_v63  ;;  %v1186_v57 = vadd.f32 %v1185_v9, %v4883_v61  ;;  %v3757_v9 = vld [vmem:[#allocation8 + $0x278] sm:$0xf0] }
 0x136   :  { %v1240_v11 = vadd.f32 %v1239_v3, %v1221_v8  ;;  %2245 = vmatpush.bf16.msra.mxu2 %v3724_v4  ;;  %2302 = vmatpush.bf16.msrb.mxu1 %v3600_v10  ;;  %v1205_v27 = vadd.f32 %v1204_v12, %v1186_v57  ;;  %v3776_v3 = vor.u32 %v4322_v0, %v3773_v41  ;;  %v4384_v0 = vld [vmem:[#allocation11 + $0x78] sm:$0xff] }
 0x137   :  { %v3884_v8 = vor.u32 %v4352_v6, %v3883_v5  ;;  %v3760_v10 = vor.u32 %v4318_v7, %v3757_v9  ;;  %v4382_v5 = vld [vmem:[#allocation11 + $0x68] sm:$0xff]  ;;  %v4373_v7 = vld [vmem:[#allocation11 + $0x20] sm:$0xff] }
 0x138   :  { %v1254_v53 = vmax.f32 %v1240_v11, 0.0  ;;  %v3867_v11 = vld [vmem:[#allocation8 + $0x348] sm:$0xf] }
 0x139   :  { %v3868_v12 = vor.u32 %v4348_v25, %v3867_v11  ;;  %v4380_v11 = vld [vmem:[#allocation11 + $0x58] sm:$0xff] }
 0x13a   :  { %v4893_v20 = vpack.c.bf16 %v1254_v53, %v1250_v16  ;;  %v1242_v24 = vpop.f32.mrf.mxu3  ;;  %2246 = vmatpush.bf16.msra.mxu2 %v3708_v17  ;;  %2303 = vmatpush.bf16.msrb.mxu1 %v3584_v21  ;;  %v1206_v40 = vpop.f32.mrf.mxu1  ;;  %v4344_v16 = vld [vmem:[#allocation8 + $0x334] sm:$0xf0]  ;;  %v4310_v53 = vld [vmem:[#allocation8 + $0x22c] sm:$0xf]  ;;  %v3725_v17 = vld [vmem:[#allocation8 + $0x238] sm:$0xf0] }
 0x13b   :  { %v1223_v22 = vpop.f32.mrf.mxu2  ;;  %v1187_v29 = vpop.f32.mrf.mxu0  ;;  %v3852_v57 = vor.u32 %v4344_v16, %v3851_v48  ;;  %v3728_v18 = vor.u32 %v4310_v53, %v3725_v17  ;;  %v3835_v21 = vld [vmem:[#allocation8 + $0x308] sm:$0xf]  ;;  %v4370_v16 = vld [vmem:[#allocation11 + $0x8] sm:$0xff] }
 0x13c   :  { %2285 = vmatmul.bf16.vlgmr.msrb.gmra.mxu0 %v4848_v23  ;;  %2114 = vmatmul.bf16.vlgmr.msra.gmra.mxu3 %v4893_v20  ;;  %v1188_v35 = vadd.f32 %v1187_v29, %v4883_v61  ;;  %v3932_v23 = vor.u32 %v4364_v34, %v3931_v33  ;;  %v1224_v38 = vadd.f32 %v1223_v22, %v1205_v27  ;;  %v3899_v61 = vld [vmem:[#allocation8 + $0x388] sm:$0xf]  ;;  %v4340_v22 = vld [vmem:[#allocation8 + $0x314] sm:$0xf0]  ;;  %v4366_v27 = vld [vmem:[#allocation8 + $0x3ec] sm:$0xf] }
 0x13d   :  { %2171 = vmatmul.bf16.vlgmr.msrb.gmra.mxu2 %v4876_v26  ;;  %2228 = vmatmul.bf16.vlgmr.msra.gmra.mxu1 %v4861_v14  ;;  %v3900_v63 = vor.u32 %v4356_v28, %v3899_v61  ;;  %v3949_v29 = vld [vmem:[#allocation8 + $0x3f8] sm:$0xf0]  ;;  %v4358_v34 = vld [vmem:[#allocation8 + $0x3ac] sm:$0xf]  ;;  %v4369_v17 = vld [vmem:[#allocation11] sm:$0xff] }
 0x13e   :  { %2258 = vmatpush.bf16.msra.mxu3 %v3948_v30  ;;  %2315 = vmatpush.bf16.msrb.mxu2 %v3824_v32  ;;  %v1207_v45 = vadd.f32 %v1206_v40, %v1188_v35  ;;  %v1243_v58 = vadd.f32 %v1242_v24, %v1224_v38  ;;  %v3836_v24 = vor.u32 %v4340_v22, %v3835_v21  ;;  %v3933_v32 = vld [vmem:[#allocation8 + $0x3d8] sm:$0xf0]  ;;  %v4378_v53 = vld [vmem:[#allocation11 + $0x48] sm:$0xff] }
 0x13f   :  { %v3952_v30 = vor.u32 %v4366_v27, %v3949_v29  ;;  %v3936_v33 = vor.u32 %v4362_v31, %v3933_v32  ;;  %v3917_v35 = vld [vmem:[#allocation8 + $0x3b8] sm:$0xf0]  ;;  %v3904_v38 = vor.u32 %v4354_v36, %v3901_v37  ;;  %2688 = vmatpush.bf16.msra.mxu1 %v4384_v0  ;;  %v1402_v27 = vperm.slane %v4940_v50, 1 }
 0x140   :  { %v1258_v1 = vmax.f32 %v1243_v58, 0.0  ;;  %v3885_v40 = vld [vmem:[#allocation8 + $0x378] sm:$0xf0] }
 0x142   :  { %2259 = vmatpush.bf16.msra.mxu3 %v3932_v23  ;;  %2316 = vmatpush.bf16.msrb.mxu2 %v3808_v39  ;;  %v1244_v60 = vpop.f32.mrf.mxu3  ;;  %v3920_v23 = vor.u32 %v4358_v34, %v3917_v35  ;;  %v4350_v39 = vld [vmem:[#allocation8 + $0x36c] sm:$0xf] }
 0x143   :  { %v1225_v52 = vpop.f32.mrf.mxu2  ;;  %v3888_v49 = vor.u32 %v4350_v39, %v3885_v40 }
 0x144   :  { %v1226_v59 = vadd.f32 %v1225_v52, %v1207_v45  ;;  %v4342_v45 = vld [vmem:[#allocation8 + $0x32c] sm:$0xf] }
 0x145   :  { %v4338_v52 = vld [vmem:[#allocation8 + $0x30c] sm:$0xf] }
 0x146   :  { %v1245_v62 = vadd.f32 %v1244_v60, %v1226_v59  ;;  %2260 = vmatpush.bf16.msra.mxu3 %v3916_v46  ;;  %2317 = vmatpush.bf16.msrb.mxu2 %v3792_v55  ;;  %v3853_v46 = vld [vmem:[#allocation8 + $0x338] sm:$0xf0] }
 0x147   :  { %v3856_v47 = vor.u32 %v4342_v45, %v3853_v46  ;;  %v3837_v55 = vld [vmem:[#allocation8 + $0x318] sm:$0xf0] }
 0x148   :  { %v1262_v2 = vmax.f32 %v1245_v62, 0.0  ;;  %v3840_v61 = vor.u32 %v4338_v52, %v3837_v55 }
 0x14a   :  { %v4900_v4 = vpack.c.bf16 %v1262_v2, %v1258_v1  ;;  %2261 = vmatpush.bf16.msra.mxu3 %v3900_v63  ;;  %2318 = vmatpush.bf16.msrb.mxu2 %v3776_v3  ;;  %v4383_v1 = vld [vmem:[#allocation11 + $0x70] sm:$0xff]  ;;  %v4374_v3 = vld [vmem:[#allocation11 + $0x28] sm:$0xff] }
 0x14b   :  { %2689 = vmatpush.bf16.msra.mxu1 %v4383_v1 }
 0x14c   :  { %2290 = vmatmul.bf16.gmra.mxu0 %v4856_v54  ;;  %2119 = vmatmul.bf16.gmra.mxu3 %v4900_v4  ;;  %v3741_v54 = vld [vmem:[#allocation8 + $0x258] sm:$0xf0] }
 0x14d   :  { %2176 = vmatmul.bf16.gmra.mxu2 %v4886_v44  ;;  %2233 = vmatmul.bf16.gmra.mxu1 %v4870_v19  ;;  %v3744_v15 = vor.u32 %v4314_v13, %v3741_v54  ;;  %v4371_v13 = vld [vmem:[#allocation11 + $0x10] sm:$0xff] }
 0x14e   :  { %2262 = vmatpush.bf16.msra.mxu3 %v3884_v8  ;;  %2319 = vmatpush.bf16.msrb.mxu2 %v3760_v10  ;;  %v4381_v8 = vld [vmem:[#allocation11 + $0x60] sm:$0xff]  ;;  %v4372_v10 = vld [vmem:[#allocation11 + $0x18] sm:$0xff]  ;;  %v4379_v54 = vld [vmem:[#allocation11 + $0x50] sm:$0xff] }
 0x14f   :  { %2690 = vmatpush.bf16.msra.mxu1 %v4382_v5 }
 0x152   :  { %2263 = vmatpush.bf16.msra.mxu3 %v3868_v12  ;;  %2320 = vmatpush.bf16.msrb.mxu2 %v3744_v15 }
 0x153   :  { %2691 = vmatpush.bf16.msra.mxu1 %v4381_v8 }
 0x156   :  { %2264 = vmatpush.bf16.msra.mxu3 %v3852_v57  ;;  %2321 = vmatpush.bf16.msrb.mxu2 %v3728_v18  ;;  %v4377_v18 = vld [vmem:[#allocation11 + $0x40] sm:$0xff] }
 0x157   :  { %2692 = vmatpush.bf16.msra.mxu1 %v4380_v11 }
 0x15a   :  { %2265 = vmatpush.bf16.msra.mxu3 %v3836_v24  ;;  %2322 = vmatpush.bf16.msrb.mxu2 %v3712_v56  ;;  %v1401_v56 = vperm.slane %v4940_v50, 0 }
 0x15b   :  { %2693 = vmatpush.bf16.msra.mxu1 %v4379_v54  ;;  %v4400_v54 = vld [vmem:[#allocation11 + $0xf8] sm:$0xff] }
 0x15c   :  { %2190 = vmatmul.bf16.vlgmr.msrb.gmra.mxu3 %v4893_v20 }
 0x15d   :  { %2247 = vmatmul.bf16.vlgmr.msra.gmra.mxu2 %v4876_v26  ;;  %2304 = vmatmul.bf16.vlgmr.msrb.gmra.mxu1 %v4861_v14  ;;  %v3869_v14 = vld [vmem:[#allocation8 + $0x358] sm:$0xf0] }
 0x15e   :  { %2334 = vmatpush.bf16.msrb.mxu3 %v3952_v30  ;;  %v3872_v43 = vor.u32 %v4346_v42, %v3869_v14 }
 0x15f   :  { %2694 = vmatpush.bf16.msra.mxu1 %v4378_v53  ;;  %v4391_v53 = vld [vmem:[#allocation11 + $0xb0] sm:$0xff] }
 0x162   :  { %2335 = vmatpush.bf16.msrb.mxu3 %v3936_v33 }
 0x163   :  { %2695 = vmatpush.bf16.msra.mxu1 %v4377_v18 }
 0x166   :  { %2336 = vmatpush.bf16.msrb.mxu3 %v3920_v23 }
 0x16a   :  { %2337 = vmatpush.bf16.msrb.mxu3 %v3904_v38 }
 0x16c   :  { %2195 = vmatmul.bf16.gmra.mxu3 %v4900_v4 }
 0x16d   :  { %2252 = vmatmul.bf16.gmra.mxu2 %v4886_v44  ;;  %2309 = vmatmul.bf16.gmra.mxu1 %v4870_v19  ;;  %v2058_v19 = vpop.f32.mrf.mxu0 }
 0x16e   :  { %2338 = vmatpush.bf16.msrb.mxu3 %v3888_v49  ;;  %v2059_v32 = vadd.f32 %v2058_v19, %v1401_v56 }
 0x172   :  { %2339 = vmatpush.bf16.msrb.mxu3 %v3872_v43 }
 0x175   :  { %v4921_v59 = vpop.f32.mrf.mxu0 }
 0x176   :  { %2340 = vmatpush.bf16.msrb.mxu3 %v3856_v47  ;;  %v2061_v42 = vadd.f32 %v4921_v59, %v1401_v56 }
 0x179   :  { %v4916_v28 = vpop.f32.mrf.mxu1 }
 0x17a   :  { %2341 = vmatpush.bf16.msrb.mxu3 %v3840_v61  ;;  %v2078_v34 = vadd.f32 %v4916_v28, %v2059_v32 }
 0x17c   :  { %2266 = vmatmul.bf16.vlgmr.msra.gmra.mxu3 %v4893_v20 }
 0x17d   :  { %2323 = vmatmul.bf16.vlgmr.msrb.gmra.mxu2 %v4876_v26  ;;  %v4928_v26 = vpop.f32.mrf.mxu0 }
 0x17e   :  { %2726 = vmatpush.bf16.msra.mxu3 %v4400_v54 }
 0x181   :  { %v4923_v60 = vpop.f32.mrf.mxu1 }
 0x182   :  { %v2080_v46 = vadd.f32 %v4923_v60, %v2061_v42 }
 0x185   :  { %v4934_v2 = vpop.f32.mrf.mxu0 }
 0x189   :  { %v4930_v63 = vpop.f32.mrf.mxu1 }
 0x18c   :  { %2271 = vmatmul.bf16.gmra.mxu3 %v4900_v4 }
 0x18d   :  { %2328 = vmatmul.bf16.gmra.mxu2 %v4886_v44  ;;  %v4376_v44 = vld [vmem:[#allocation11 + $0x38] sm:$0xff]  ;;  %v2134_v25 = vpop.f32.mrf.mxu0 }
 0x18e   :  { %2669 = vmatpush.bf16.msra.mxu0 %v4376_v44  ;;  %v2135_v33 = vadd.f32 %v2134_v25, %v1402_v27 }
 0x191   :  { %v4936_v6 = vpop.f32.mrf.mxu1 }
 0x195   :  { %v2136_v57 = vpop.f32.mrf.mxu0 }
 0x196   :  { %v2137_v14 = vadd.f32 %v2136_v57, %v1402_v27  ;;  %v4399_v57 = vld [vmem:[#allocation11 + $0xf0] sm:$0xff] }
 0x197   :  { %2727 = vmatpush.bf16.msra.mxu3 %v4399_v57 }
 0x19a   :  { %v2153_v12 = vpop.f32.mrf.mxu1 }
 0x19b   :  { %v2154_v35 = vadd.f32 %v2153_v12, %v2135_v33  ;;  %v4397_v33 = vld [vmem:[#allocation11 + $0xe0] sm:$0xff] }
 0x19c   :  { %2342 = vmatmul.bf16.vlgmr.msrb.gmra.mxu3 %v4893_v20  ;;  %v4375_v20 = vld [vmem:[#allocation11 + $0x30] sm:$0xff] }
 0x19d   :  { %2670 = vmatpush.bf16.msra.mxu0 %v4375_v20  ;;  %v2139_v51 = vpop.f32.mrf.mxu0 }
 0x19e   :  { %v2140_v44 = vadd.f32 %v2139_v51, %v1402_v27 }
 0x19f   :  { %v4919_v58 = vpop.f32.mrf.mxu2 }
 0x1a0   :  { %v2097_v23 = vadd.f32 %v4919_v58, %v2078_v34  ;;  %v2064_v58 = vadd.f32 %v4928_v26, %v1401_v56 }
 0x1a1   :  { %2671 = vmatpush.bf16.msra.mxu0 %v4374_v3 }
 0x1a2   :  { %v2155_v21 = vpop.f32.mrf.mxu1  ;;  %v2083_v59 = vadd.f32 %v4930_v63, %v2064_v58  ;;  %v4392_v63 = vld [vmem:[#allocation11 + $0xb8] sm:$0xff] }
 0x1a3   :  { %v2156_v47 = vadd.f32 %v2155_v21, %v2137_v14  ;;  %2707 = vmatpush.bf16.msra.mxu2 %v4392_v63  ;;  %v4387_v14 = vld [vmem:[#allocation11 + $0x90] sm:$0xff] }
 0x1a5   :  { %2672 = vmatpush.bf16.msra.mxu0 %v4373_v7  ;;  %v2141_v37 = vpop.f32.mrf.mxu0 }
 0x1a7   :  { %v4925_v62 = vpop.f32.mrf.mxu2  ;;  %2708 = vmatpush.bf16.msra.mxu2 %v4391_v53 }
 0x1a8   :  { %v2099_v52 = vadd.f32 %v4925_v62, %v2080_v46 }
 0x1a9   :  { %2673 = vmatpush.bf16.msra.mxu0 %v4372_v10 }
 0x1aa   :  { %v2158_v29 = vpop.f32.mrf.mxu1 }
 0x1ab   :  { %v2159_v1 = vadd.f32 %v2158_v29, %v2140_v44  ;;  %v4390_v29 = vld [vmem:[#allocation11 + $0xa8] sm:$0xff] }
 0x1ac   :  { %2347 = vmatmul.bf16.gmra.mxu3 %v4900_v4  ;;  %2709 = vmatpush.bf16.msra.mxu2 %v4390_v29 }
 0x1ad   :  { %2674 = vmatpush.bf16.msra.mxu0 %v4371_v13  ;;  %v4952_v0 = vpop.f32.mrf.mxu0 }
 0x1af   :  { %v4932_v41 = vpop.f32.mrf.mxu2 }
 0x1b1   :  { %2675 = vmatpush.bf16.msra.mxu0 %v4370_v16 }
 0x1b2   :  { %v2160_v49 = vpop.f32.mrf.mxu1 }
 0x1b5   :  { %2676 = vmatpush.bf16.msra.mxu0 %v4369_v17  ;;  %v4961_v17 = vpop.f32.mrf.mxu0 }
 0x1b7   :  { %v4938_v4 = vpop.f32.mrf.mxu2 }
 0x1ba   :  { %v4955_v3 = vpop.f32.mrf.mxu1 }
 0x1bf   :  { %v2115_v9 = vpop.f32.mrf.mxu3 }
 0x1c0   :  { %v2172_v15 = vpop.f32.mrf.mxu2  ;;  %v2116_v39 = vadd.f32 %v2115_v9, %v2097_v23  ;;  %v2102_v9 = vadd.f32 %v4932_v41, %v2083_v59 }
 0x1c1   :  { %v2173_v36 = vadd.f32 %v2172_v15, %v2154_v35  ;;  %v2066_v15 = vadd.f32 %v4934_v2, %v1401_v56 }
 0x1c2   :  { %v4964_v21 = vpop.f32.mrf.mxu1 }
 0x1c3   :  { %v2085_v41 = vadd.f32 %v4936_v6, %v2066_v15  ;;  %v4389_v6 = vld [vmem:[#allocation11 + $0xa0] sm:$0xff] }
 0x1c4   :  { %2710 = vmatpush.bf16.msra.mxu2 %v4389_v6 }
 0x1c7   :  { %v2117_v48 = vpop.f32.mrf.mxu3 }
 0x1c8   :  { %v2174_v22 = vpop.f32.mrf.mxu2  ;;  %v2118_v19 = vadd.f32 %v2117_v48, %v2099_v52  ;;  %v2142_v48 = vadd.f32 %v2141_v37, %v1402_v27  ;;  %v4394_v52 = vld [vmem:[#allocation11 + $0xc8] sm:$0xff] }
 0x1c9   :  { %v2175_v55 = vadd.f32 %v2174_v22, %v2156_v47  ;;  %v2104_v22 = vadd.f32 %v4938_v4, %v2085_v41  ;;  %v4386_v47 = vld [vmem:[#allocation11 + $0x88] sm:$0xff] }
 0x1ca   :  { %v2161_v18 = vadd.f32 %v2160_v49, %v2142_v48  ;;  %v4396_v49 = vld [vmem:[#allocation11 + $0xd8] sm:$0xff] }
 0x1cf   :  { %v2120_v24 = vpop.f32.mrf.mxu3 }
 0x1d0   :  { %v2177_v31 = vpop.f32.mrf.mxu2  ;;  %v2121_v12 = vadd.f32 %v2120_v24, %v2102_v9 }
 0x1d1   :  { %v2178_v10 = vadd.f32 %v2177_v31, %v2159_v1  ;;  %v4398_v31 = vld [vmem:[#allocation11 + $0xe8] sm:$0xff]  ;;  %v1403_v1 = vperm.slane %v4940_v50, 2 }
 0x1d2   :  { %2728 = vmatpush.bf16.msra.mxu3 %v4398_v31 }
 0x1d3   :  { %v2213_v48 = vadd.f32 %v4961_v17, %v1403_v1 }
 0x1d5   :  { %v2232_v53 = vadd.f32 %v4964_v21, %v2213_v48 }
 0x1d6   :  { %2729 = vmatpush.bf16.msra.mxu3 %v4397_v33 }
 0x1d7   :  { %v4944_v30 = vpop.f32.mrf.mxu3 }
 0x1d8   :  { %v2179_v45 = vpop.f32.mrf.mxu2  ;;  %v2123_v56 = vadd.f32 %v4944_v30, %v2104_v22 }
 0x1d9   :  { %v2180_v24 = vadd.f32 %v2179_v45, %v2161_v18 }
 0x1da   :  { %2730 = vmatpush.bf16.msra.mxu3 %v4396_v49 }
 0x1df   :  { %v2191_v38 = vpop.f32.mrf.mxu3 }
 0x1e0   :  { %v2192_v40 = vadd.f32 %v2191_v38, %v2173_v36  ;;  %v4957_v8 = vpop.f32.mrf.mxu2  ;;  %v2215_v36 = vpop.f32.mrf.mxu0 }
 0x1e2   :  { %v2353_v43 = vpack.c.bf16 %v2192_v40, %v2116_v39  ;;  %v2234_v39 = vpop.f32.mrf.mxu1  ;;  %v4388_v40 = vld [vmem:[#allocation11 + $0x98] sm:$0xff] }
 0x1e3   :  { %2711 = vmatpush.bf16.msra.mxu2 %v4388_v40 }
 0x1e4   :  { %2361 = vst [vmem:[#allocation14] sm:$0xff] %v2353_v43  ;;  %v2445_v60 = vunpack.c.l.b16 %v2353_v43  ;;  %v2446_v5 = vunpack.c.h.b16 %v2353_v43  ;;  %v4395_v43 = vld [vmem:[#allocation11 + $0xd0] sm:$0xff] }
 0x1e5   :  { %2731 = vmatpush.bf16.msra.mxu3 %v4395_v43 }
 0x1e7   :  { %v2193_v61 = vpop.f32.mrf.mxu3  ;;  %2712 = vmatpush.bf16.msra.mxu2 %v4387_v14 }
 0x1e8   :  { %v2194_v28 = vadd.f32 %v2193_v61, %v2175_v55  ;;  %v4967_v2 = vpop.f32.mrf.mxu2  ;;  %v4970_v45 = vpop.f32.mrf.mxu0 }
 0x1e9   :  { %2732 = vmatpush.bf16.msra.mxu3 %v4394_v52  ;;  %v2218_v40 = vadd.f32 %v4970_v45, %v1403_v1 }
 0x1ea   :  { %v2355_v20 = vpack.c.bf16 %v2194_v28, %v2118_v19  ;;  %v4972_v55 = vpop.f32.mrf.mxu1  ;;  %v4385_v19 = vld [vmem:[#allocation11 + $0x80] sm:$0xff] }
 0x1eb   :  { %2713 = vmatpush.bf16.msra.mxu2 %v4386_v47  ;;  %v4393_v28 = vld [vmem:[#allocation11 + $0xc0] sm:$0xff]  ;;  %v2237_v43 = vadd.f32 %v4972_v55, %v2218_v40  ;;  %v4407_v55 = vld [vmem:[#allocation13 + $0x30] sm:$0xff] }
 0x1ec   :  { %2363 = vst [vmem:[#allocation14 + $0x10] sm:$0xff] %v2355_v20  ;;  %v2449_v7 = vunpack.c.l.b16 %v2355_v20  ;;  %v2450_v62 = vunpack.c.h.b16 %v2355_v20 }
 0x1ed   :  { %2733 = vmatpush.bf16.msra.mxu3 %v4393_v28 }
 0x1ee   :  { %v2461_v26 = vpack.c.b16 %v2449_v7, %v2445_v60  ;;  %v2462_v11 = vpack.c.b16 %v2450_v62, %v2446_v5  ;;  %v1404_v60 = vperm.slane %v4940_v50, 3  ;;  %v2211_v7 = vadd.f32 %v4952_v0, %v1403_v1 }
 0x1ef   :  { %v2196_v25 = vpop.f32.mrf.mxu3  ;;  %2714 = vmatpush.bf16.msra.mxu2 %v4385_v19 }
 0x1f0   :  { %v2197_v13 = vadd.f32 %v2196_v25, %v2178_v10  ;;  %2677 = vmatmul.bf16.vlgmr.msra.gmra.mxu0 %v2461_v26  ;;  %2696 = vmatmul.bf16.vlgmr.msra.gmra.mxu1 %v2462_v11  ;;  %v2253_v42 = vpop.f32.mrf.mxu2  ;;  %v2286_v44 = vpop.f32.mrf.mxu0  ;;  %v2230_v10 = vadd.f32 %v4955_v3, %v2211_v7  ;;  %v2251_v3 = vadd.f32 %v4967_v2, %v2232_v53 }
 0x1f1   :  { %v2287_v62 = vadd.f32 %v2286_v44, %v1404_v60 }
 0x1f2   :  { %v2357_v16 = vpack.c.bf16 %v2197_v13, %v2121_v12  ;;  %v2305_v20 = vpop.f32.mrf.mxu1  ;;  %v2249_v25 = vadd.f32 %v4957_v8, %v2230_v10  ;;  %v4402_v10 = vld [vmem:[#allocation13 + $0x8] sm:$0xff] }
 0x1f3   :  { %v2306_v26 = vadd.f32 %v2305_v20, %v2287_v62  ;;  %v4404_v62 = vld [vmem:[#allocation13 + $0x18] sm:$0xff] }
 0x1f4   :  { %2365 = vst [vmem:[#allocation14 + $0x20] sm:$0xff] %v2357_v16  ;;  %v2453_v34 = vunpack.c.l.b16 %v2357_v16  ;;  %v2454_v4 = vunpack.c.h.b16 %v2357_v16 }
 0x1f7   :  { %v2198_v51 = vpop.f32.mrf.mxu3 }
 0x1f8   :  { %v2199_v27 = vadd.f32 %v2198_v51, %v2180_v24  ;;  %v4974_v61 = vpop.f32.mrf.mxu2  ;;  %v2288_v9 = vpop.f32.mrf.mxu0  ;;  %v2216_v51 = vadd.f32 %v2215_v36, %v1403_v1 }
 0x1f9   :  { %v2289_v16 = vadd.f32 %v2288_v9, %v1404_v60  ;;  %v4403_v9 = vld [vmem:[#allocation13 + $0x10] sm:$0xff] }
 0x1fa   :  { %v2359_v32 = vpack.c.bf16 %v2199_v27, %v2123_v56  ;;  %v2307_v11 = vpop.f32.mrf.mxu1  ;;  %v2235_v31 = vadd.f32 %v2234_v39, %v2216_v51 }
 0x1fb   :  { %v2308_v0 = vadd.f32 %v2307_v11, %v2289_v16 }
 0x1fc   :  { %2367 = vst [vmem:[#allocation14 + $0x30] sm:$0xff] %v2359_v32  ;;  %v2457_v35 = vunpack.c.l.b16 %v2359_v32  ;;  %v2458_v23 = vunpack.c.h.b16 %v2359_v32 }
 0x1fe   :  { %v2465_v37 = vpack.c.b16 %v2457_v35, %v2453_v34  ;;  %v2466_v38 = vpack.c.b16 %v2458_v23, %v2454_v4  ;;  %v2254_v34 = vadd.f32 %v2253_v42, %v2235_v31  ;;  %v2256_v42 = vadd.f32 %v4974_v61, %v2237_v43  ;;  %v4406_v61 = vld [vmem:[#allocation13 + $0x28] sm:$0xff] }
 0x1ff   :  { %v2267_v30 = vpop.f32.mrf.mxu3 }
 0x200   :  { %2682 = vmatmul.bf16.gmra.mxu0 %v2465_v37  ;;  %2701 = vmatmul.bf16.gmra.mxu1 %v2466_v38  ;;  %v2324_v59 = vpop.f32.mrf.mxu2  ;;  %v2268_v54 = vadd.f32 %v2267_v30, %v2249_v25  ;;  %v2291_v57 = vpop.f32.mrf.mxu0 }
 0x201   :  { %v2325_v12 = vadd.f32 %v2324_v59, %v2306_v26  ;;  %v2292_v56 = vadd.f32 %v2291_v57, %v1404_v60  ;;  %v4401_v26 = vld [vmem:[#allocation13] sm:$0xff] }
 0x202   :  { %v2310_v18 = vpop.f32.mrf.mxu1 }
 0x203   :  { %v2311_v17 = vadd.f32 %v2310_v18, %v2292_v56 }
 0x207   :  { %v2269_v46 = vpop.f32.mrf.mxu3 }
 0x208   :  { %v2326_v13 = vpop.f32.mrf.mxu2  ;;  %v2270_v8 = vadd.f32 %v2269_v46, %v2251_v3  ;;  %v2293_v23 = vpop.f32.mrf.mxu0 }
 0x209   :  { %v2327_v41 = vadd.f32 %v2326_v13, %v2308_v0  ;;  %v2294_v39 = vadd.f32 %v2293_v23, %v1404_v60  ;;  %v4408_v60 = vld [vmem:[#allocation13 + $0x38] sm:$0xff] }
 0x20a   :  { %v2312_v36 = vpop.f32.mrf.mxu1  ;;  %2819 = vmatpush.bf16.msrb.mxu0 %v4408_v60  ;;  %4420 = vmatpush.bf16.msrb.mxu1 %v4408_v60 }
 0x20b   :  { %v2313_v46 = vadd.f32 %v2312_v36, %v2294_v39  ;;  %v2838_v39 = vlaneseq }
 0x20e   :  { %2820 = vmatpush.bf16.msrb.mxu0 %v4407_v55  ;;  %4421 = vmatpush.bf16.msrb.mxu1 %v4407_v55 }
 0x20f   :  { %v2272_v58 = vpop.f32.mrf.mxu3 }
 0x210   :  { %v2329_v27 = vpop.f32.mrf.mxu2  ;;  %v2273_v38 = vadd.f32 %v2272_v58, %v2254_v34 }
 0x211   :  { %v2330_v35 = vadd.f32 %v2329_v27, %v2311_v17 }
 0x212   :  { %2821 = vmatpush.bf16.msrb.mxu0 %v4406_v61  ;;  %4422 = vmatpush.bf16.msrb.mxu1 %v4406_v61 }
 0x217   :  { %v2274_v5 = vpop.f32.mrf.mxu3 }
 0x218   :  { %v2331_v14 = vpop.f32.mrf.mxu2  ;;  %v2275_v19 = vadd.f32 %v2274_v5, %v2256_v42  ;;  %v4405_v5 = vld [vmem:[#allocation13 + $0x20] sm:$0xff] }
 0x219   :  { %v2332_v47 = vadd.f32 %v2331_v14, %v2313_v46  ;;  %2822 = vmatpush.bf16.msrb.mxu0 %v4405_v5  ;;  %4423 = vmatpush.bf16.msrb.mxu1 %v4405_v5  ;;  %v4444_v14 = vld [vmem:[%s5013_s8] ss:$0 sm:$0xff] }
 0x21d   :  { %2823 = vmatpush.bf16.msrb.mxu0 %v4404_v62  ;;  %4424 = vmatpush.bf16.msrb.mxu1 %v4404_v62 }
 0x21f   :  { %v2343_v63 = vpop.f32.mrf.mxu3 }
 0x220   :  { %v2344_v15 = vadd.f32 %v2343_v63, %v2325_v12  ;;  %v4443_v12 = vld [vmem:[%s5011_s6] ss:$0 sm:$0xff] }
 0x221   :  { %2824 = vmatpush.bf16.msrb.mxu0 %v4403_v9  ;;  %4425 = vmatpush.bf16.msrb.mxu1 %v4403_v9 }
 0x222   :  { %v2354_v50 = vpack.c.bf16 %v2344_v15, %v2268_v54 }
 0x224   :  { %2362 = vst [vmem:[#allocation14 + $0x8] sm:$0xff] %v2354_v50  ;;  %v2447_v32 = vunpack.c.l.b16 %v2354_v50  ;;  %v2448_v6 = vunpack.c.h.b16 %v2354_v50 }
 0x225   :  { %2825 = vmatpush.bf16.msrb.mxu0 %v4402_v10  ;;  %4426 = vmatpush.bf16.msrb.mxu1 %v4402_v10 }
 0x227   :  { %v2345_v22 = vpop.f32.mrf.mxu3 }
 0x228   :  { %v2346_v24 = vadd.f32 %v2345_v22, %v2327_v41 }
 0x229   :  { %2826 = vmatpush.bf16.msrb.mxu0 %v4401_v26  ;;  %4427 = vmatpush.bf16.msrb.mxu1 %v4401_v26 }
 0x22a   :  { %v2356_v29 = vpack.c.bf16 %v2346_v24, %v2270_v8 }
 0x22c   :  { %2364 = vst [vmem:[#allocation14 + $0x18] sm:$0xff] %v2356_v29  ;;  %v2451_v21 = vunpack.c.l.b16 %v2356_v29  ;;  %v2452_v33 = vunpack.c.h.b16 %v2356_v29 }
 0x22e   :  { %v2463_v4 = vpack.c.b16 %v2451_v21, %v2447_v32  ;;  %v2464_v2 = vpack.c.b16 %v2452_v33, %v2448_v6 }
 0x22f   :  { %v2348_v37 = vpop.f32.mrf.mxu3 }
 0x230   :  { %v2349_v30 = vadd.f32 %v2348_v37, %v2330_v35  ;;  %2715 = vmatmul.bf16.vlgmr.msra.gmra.mxu2 %v2463_v4  ;;  %2734 = vmatmul.bf16.vlgmr.msra.gmra.mxu3 %v2464_v2 }
 0x232   :  { %v2358_v49 = vpack.c.bf16 %v2349_v30, %v2273_v38 }
 0x234   :  { %2366 = vst [vmem:[#allocation14 + $0x28] sm:$0xff] %v2358_v49  ;;  %v2455_v44 = vunpack.c.l.b16 %v2358_v49  ;;  %v2456_v59 = vunpack.c.h.b16 %v2358_v49  ;;  %v2839_v49 = vand.u32 127, %v2838_v39 }
 0x236   :  { %vm2840_vm0 = vcmp.lt.s32.totalorder %v2839_v49, 4 }
 0x237   :  { %v2350_v52 = vpop.f32.mrf.mxu3 }
 0x238   :  { %v2351_v28 = vadd.f32 %v2350_v52, %v2332_v47 }
 0x23a   :  { %v2360_v58 = vpack.c.bf16 %v2351_v28, %v2275_v19 }
 0x23c   :  { %2368 = vst [vmem:[#allocation14 + $0x38] sm:$0xff] %v2360_v58  ;;  %v2459_v20 = vunpack.c.l.b16 %v2360_v58  ;;  %v2460_v7 = vunpack.c.h.b16 %v2360_v58 }
 0x23e   :  { %v2467_v45 = vpack.c.b16 %v2459_v20, %v2455_v44  ;;  %v2468_v1 = vpack.c.b16 %v2460_v7, %v2456_v59 }
 0x240   :  { %2720 = vmatmul.bf16.gmra.mxu2 %v2467_v45  ;;  %2739 = vmatmul.bf16.gmra.mxu3 %v2468_v1 }
 0x26d   :  { %v2678_v11 = vpop.f32.mrf.mxu0  ;;  %v2697_v25 = vpop.f32.mrf.mxu1 }
 0x26e   :  { %v2679_v63 = vadd.f32 %v4443_v12, %v2678_v11 }
 0x270   :  { %v2698_v16 = vadd.f32 %v2697_v25, %v2679_v63 }
 0x275   :  { %v2680_v13 = vpop.f32.mrf.mxu0  ;;  %v2699_v48 = vpop.f32.mrf.mxu1 }
 0x276   :  { %v2681_v50 = vadd.f32 %v4443_v12, %v2680_v13 }
 0x278   :  { %v2700_v57 = vadd.f32 %v2699_v48, %v2681_v50 }
 0x27d   :  { %v2683_v53 = vpop.f32.mrf.mxu0  ;;  %v2702_v24 = vpop.f32.mrf.mxu1 }
 0x27e   :  { %v2684_v27 = vadd.f32 %v4443_v12, %v2683_v53 }
 0x280   :  { %v2703_v6 = vadd.f32 %v2702_v24, %v2684_v27 }
 0x285   :  { %v2685_v29 = vpop.f32.mrf.mxu0  ;;  %v2704_v34 = vpop.f32.mrf.mxu1 }
 0x286   :  { %v2686_v21 = vadd.f32 %v4443_v12, %v2685_v29 }
 0x288   :  { %v2705_v35 = vadd.f32 %v2704_v34, %v2686_v21 }
 0x2b3   :  { %v2716_v54 = vpop.f32.mrf.mxu2  ;;  %v2735_v15 = vpop.f32.mrf.mxu3 }
 0x2b4   :  { %v2717_v0 = vadd.f32 %v2716_v54, %v2698_v16 }
 0x2b6   :  { %v2736_v18 = vadd.f32 %v2735_v15, %v2717_v0 }
 0x2b8   :  { %v2745_v51 = vmax.f32 %v2736_v18, 0.0 }
 0x2bb   :  { %v2718_v3 = vpop.f32.mrf.mxu2  ;;  %v2737_v41 = vpop.f32.mrf.mxu3 }
 0x2bc   :  { %v2719_v22 = vadd.f32 %v2718_v3, %v2700_v57 }
 0x2be   :  { %v2738_v8 = vadd.f32 %v2737_v41, %v2719_v22 }
 0x2c0   :  { %v2746_v56 = vmax.f32 %v2738_v8, 0.0 }
 0x2c2   :  { %v2749_v31 = vpack.c.bf16 %v2746_v56, %v2745_v51 }
 0x2c3   :  { %v2721_v17 = vpop.f32.mrf.mxu2  ;;  %v2740_v32 = vpop.f32.mrf.mxu3 }
 0x2c4   :  { %2827 = vmatmul.bf16.vlgmr.msrb.gmra.mxu0 %v2749_v31  ;;  %v2722_v33 = vadd.f32 %v2721_v17, %v2703_v6 }
 0x2c6   :  { %v2741_v2 = vadd.f32 %v2740_v32, %v2722_v33 }
 0x2c8   :  { %v2747_v30 = vmax.f32 %v2741_v2, 0.0 }
 0x2cb   :  { %v2723_v4 = vpop.f32.mrf.mxu2  ;;  %v2742_v37 = vpop.f32.mrf.mxu3 }
 0x2cc   :  { %v2724_v23 = vadd.f32 %v2723_v4, %v2705_v35 }
 0x2ce   :  { %v2743_v38 = vadd.f32 %v2742_v37, %v2724_v23 }
 0x2d0   :  { %v2748_v36 = vmax.f32 %v2743_v38, 0.0 }
 0x2d2   :  { %v2750_v40 = vpack.c.bf16 %v2748_v36, %v2747_v30 }
 0x2d4   :  { %2832 = vmatmul.bf16.vlgmr.msrb.gmra.mxu1 %v2750_v40 }
 0x341   :  { %v2828_v43 = vpop.f32.mrf.mxu0 }
 0x342   :  { %v2829_v46 = vadd.f32 %v4444_v14, %v2828_v43 }
 0x344   :  { %v2841_v42 = vsel %vm2840_vm0, %v2829_v46, -inf }
 0x345   :  { %2845 = vmax.xlane.f32.xlu0 %v2841_v42 }
 0x349   :  { %v2830_v47 = vpop.f32.mrf.mxu0 }
 0x34a   :  { %v2831_v52 = vadd.f32 %v4444_v14, %v2830_v47 }
 0x34c   :  { %v2842_v19 = vsel %vm2840_vm0, %v2831_v52, -inf }
 0x34d   :  { %2847 = vmax.xlane.f32.xlu0 %v2842_v19 }
 0x351   :  { %v2833_v28 = vpop.f32.mrf.mxu1 }
 0x352   :  { %v2834_v58 = vadd.f32 %v4444_v14, %v2833_v28 }
 0x354   :  { %v2843_v44 = vsel %vm2840_vm0, %v2834_v58, -inf }
 0x355   :  { %2849 = vmax.xlane.f32.xlu1 %v2843_v44 }
 0x359   :  { %v2835_v20 = vpop.f32.mrf.mxu1 }
 0x35a   :  { %v2836_v59 = vadd.f32 %v4444_v14, %v2835_v20 }
 0x35c   :  { %v2844_v7 = vsel %vm2840_vm0, %v2836_v59, -inf }
 0x35d   :  { %2851 = vmax.xlane.f32.xlu1 %v2844_v7 }
 0x3b8   :  { %v2846_v45 = vpop.xlane.xlu0 %2845 }
 0x3b9   :  { %v2853_v1 = vsub.f32 %v2841_v42, %v2846_v45 }
 0x3bb   :  { %v2857_v60 = vmul.f32 1.442695, %v2853_v1 }
 0x3bd   :  { %4445 = vpow2.f32 %v2857_v60 }
 0x3c0   :  { %v2848_v55 = vpop.xlane.xlu0 %2847 }
 0x3c1   :  { %v2854_v61 = vsub.f32 %v2842_v19, %v2848_v55 }
 0x3c3   :  { %v4446_v5 = vpop.eup %4445  ;;  %v2859_v62 = vmul.f32 1.442695, %v2854_v61 }
 0x3c4   :  { %2865 = vadd.xlane.f32.xlu2 %v4446_v5 }
 0x3c5   :  { %4447 = vpow2.f32 %v2859_v62 }
 0x3c8   :  { %v2850_v9 = vpop.xlane.xlu1 %2849 }
 0x3c9   :  { %v2855_v10 = vsub.f32 %v2843_v44, %v2850_v9 }
 0x3cb   :  { %v4448_v26 = vpop.eup %4447  ;;  %v2861_v11 = vmul.f32 1.442695, %v2855_v10 }
 0x3cc   :  { %2867 = vadd.xlane.f32.xlu2 %v4448_v26 }
 0x3cd   :  { %4449 = vpow2.f32 %v2861_v11 }
 0x3d0   :  { %v2852_v25 = vpop.xlane.xlu1 %2851 }
 0x3d1   :  { %v2856_v12 = vsub.f32 %v2844_v7, %v2852_v25 }
 0x3d3   :  { %v4450_v13 = vpop.eup %4449  ;;  %v2863_v63 = vmul.f32 1.442695, %v2856_v12 }
 0x3d4   :  { %2869 = vadd.xlane.f32.xlu0 %v4450_v13 }
 0x3d5   :  { %4451 = vpow2.f32 %v2863_v63 }
 0x3db   :  { %v4452_v54 = vpop.eup %4451 }
 0x3dc   :  { %2871 = vadd.xlane.f32.xlu1 %v4452_v54 }
 0x437   :  { %v2866_v15 = vpop.xlane.xlu2 %2865 }
 0x438   :  { %4453 = vrcp.f32 %v2866_v15 }
 0x43e   :  { %v4454_v16 = vpop.eup %4453 }
 0x43f   :  { %v2868_v48 = vpop.xlane.xlu2 %2867  ;;  %v2877_v53 = vmul.f32 %v4454_v16, %v4446_v5 }
 0x440   :  { %4455 = vrcp.f32 %v2868_v48 }
 0x446   :  { %v4456_v50 = vpop.eup %4455 }
 0x447   :  { %v2878_v0 = vmul.f32 %v4456_v50, %v4448_v26  ;;  %v2870_v3 = vpop.xlane.xlu0 %2869 }
 0x448   :  { %4457 = vrcp.f32 %v2870_v3 }
 0x449   :  { %v4412_v57 = vpack.c.bf16 %v2878_v0, %v2877_v53 }
 0x44b   :  { %4413 = vst [vmem:[#allocation15] sm:$0xff] %v4412_v57  }
 0x44e   :  { %v4458_v18 = vpop.eup %4457 }
 0x44f   :  { %v2872_v41 = vpop.xlane.xlu1 %2871  ;;  %v2879_v8 = vmul.f32 %v4458_v18, %v4450_v13 }
 0x450   :  { %4459 = vrcp.f32 %v2872_v41 }
 0x456   :  { %v4460_v22 = vpop.eup %4459 }
 0x457   :  { %v2880_v24 = vmul.f32 %v4460_v22, %v4452_v54 }
 0x459   :  { %v4417_v51 = vpack.c.bf16 %v2880_v24, %v2879_v8 }
 0x45b   :  { %4419 = vst [vmem:[#allocation15 + $0x8] sm:$0xff] %v4417_v51  }
 0x45c   :  { %2892 = vsyncadd [#allocation4], 256  ;;  %s2895_s5 = sshll.u32 %s5014_s9, 4  ;;  %s4702_s13 = smov [#allocation14]   ;;  %s2896_s5 = int_to_ptr.hbm [resolvable:$true] %s2895_s5 }
 0x45d   :  { %s2893_s14 = sshll.u32 %s4702_s13, 4  ;;  %s2894_s14 = int_to_ptr.vmem [resolvable:$true] %s2893_s14 }
 0x45e   :  { %2901 = dma.vmem_to_hbm [thread:$0]  %s2894_s14, 768, %s2896_s5, [#allocation4], %s4690_s21, %s4690_s21, %s4691_s22  }
 0x45f   :  { %2905 = vsyncadd [#allocation16], 64  ;;  %s2908_s17 = sshll.u32 %s5015_s10, 4  ;;  %s4703_s18 = smov [#allocation15]   ;;  %s2909_s17 = int_to_ptr.hbm [resolvable:$true] %s2908_s17 }
 0x460   :  { %s2906_s19 = sshll.u32 %s4703_s18, 4  ;;  %s2907_s19 = int_to_ptr.vmem [resolvable:$true] %s2906_s19 }
 0x461   :  { %2914 = dma.vmem_to_hbm [thread:$0]  %s2907_s19, 192, %s2909_s17, [#allocation16], %s4694_s11, %s4694_s11, %s4695_s12  }
 0x462   :  { %4685 = dma.done.wait [#allocation4], 1024  }
 0x463   :  { %4686 = vsyncadd [#allocation4], 4294966272 }
 0x464   :  { %4687 = dma.done.wait [#allocation16], 256  }
 0x465   :  { %4688 = vsyncadd [#allocation16], 4294967040 }
 0x466   :  { %2923 = vsyncpa [#allocation3], 1 }
 0x467   :  { %2924 = vsyncpa [#allocation6], 1 }
 0x468   :  { %2925 = vsyncpa [#allocation9], 1 }
 0x469   :  { %2926 = vsyncpa [#allocation12], 1 }
 0x46a   :  { %2927 = vsyncpa [#allocation4], 1 }
 0x46b   :  { %2928 = vsyncpa [#allocation16], 1 }

</bundles_post_ra>
